<compile_context>
chip_gen: v7x
topology: tpu7x:2x2x1
jax: 0.10.0
libtpu: 0.0.40
codegen_flags: <defaults>
</compile_context>

<pallas_src>
import functools

import jax
import jax.numpy as jnp
import numpy as np
from jax import lax
from jax.experimental import pallas as pl
from jax.experimental.pallas import tpu as pltpu

BN_EPS = 1e-5


def _round_up(x, m):
    return ((x + m - 1) // m) * m


_VMEM_LIMIT_CACHE = None


def _vmem_limit_bytes():
    """Generation-aware scoped-VMEM limit (headroom below physical VMEM)."""
    global _VMEM_LIMIT_CACHE
    if _VMEM_LIMIT_CACHE is None:
        try:
            cap = int(pltpu.get_tpu_info().vmem_capacity_bytes)
        except Exception:                      # pragma: no cover - defensive
            cap = 64 * 1024 * 1024
        _VMEM_LIMIT_CACHE = int(max(32 * 1024 * 1024,
                                    min(cap - 16 * 1024 * 1024,
                                        100 * 1024 * 1024)))
    return _VMEM_LIMIT_CACHE


# ----------------------------------------------------------------------------
# One ResnetInit layer on a channel-fused NHWC activation.
#   x: (N, H, W, 2*C_in) bf16, channels = [residual | transient]
#   returns (N, Ho, Wo, 2*C_out) bf16, channels = [residual | transient]
# ----------------------------------------------------------------------------
def resnet_init_apply_fused(x, p, stride):
    N, H, W, _ = x.shape
    s = int(stride)
    c_in = p["w_rr"].shape[2]
    c_out = p["w_rr"].shape[3]
    assert x.shape[-1] == 2 * c_in

    Ho = (H - 1) // s + 1
    Wo = (W - 1) // s + 1
    Hp, Wp = H + 2, W + 2                     # +1 halo on each side (padding=1)
    Hq, Wq = -(-Hp // s), -(-Wp // s)         # per-phase spatial extents
    Lq = (Hq + 1) * Wq                        # +1 zero row keeps tap slabs in-bounds
    M_slab = Ho * Wq                          # per-image rows incl. (Wq-Wo) junk cols
    M_valid = N * Ho * Wo                     # true BN population size
    C2 = 2 * c_out
    C2p = _round_up(C2, 128)                  # lane-dense output columns
    Kc = 2 * c_in
    inv_m = 1.0 / float(M_valid)
    vmem_limit = _vmem_limit_bytes()

    # --- activation staging: pad halo, phase-split by stride, flatten rows ---
    x = x.astype(jnp.bfloat16)
    x_pad = jnp.pad(x, ((0, 0), (1, 1 + Hq * s - Hp), (1, 1 + Wq * s - Wp), (0, 0)))
    x_ph = x_pad.reshape(N, Hq, s, Wq, s, Kc).transpose(0, 2, 4, 1, 3, 5)
    x_ph = x_ph.reshape(N, s * s, Hq, Wq, Kc)
    x_ph = jnp.pad(x_ph, ((0, 0), (0, 0), (0, 1), (0, 0), (0, 0)))
    x_flat = x_ph.reshape(N, s * s, Lq, Kc)

    # --- fused weights: fold shortcut into the center tap, pad cols to C2p ---
    w_rr = p["w_rr"].at[1, 1].add(p["w_sc"])                  # 1x1/identity shortcut
    w_top = jnp.concatenate([w_rr, p["w_rt"]], axis=-1)       # rows fed by residual in
    w_bot = jnp.concatenate([p["w_tr"], p["w_tt"]], axis=-1)  # rows fed by transient in
    w = jnp.concatenate([w_top, w_bot], axis=2)               # (3,3,2C_in,2C_out)
    w = w.reshape(9 * Kc, C2)
    w = jnp.pad(w, ((0, 0), (0, C2p - C2))).astype(jnp.bfloat16)
    # Conv/shortcut biases are dropped: training-mode BN subtracts the batch
    # mean, so per-channel constants cancel exactly.

    gamma = jnp.pad(jnp.concatenate([p["gamma_r"], p["gamma_t"]]), (0, C2p - C2))
    beta = jnp.pad(jnp.concatenate([p["beta_r"], p["beta_t"]]), (0, C2p - C2))
    gb = jnp.stack([gamma, beta]).astype(jnp.float32)         # (2, C2p)

    # Compile-time row mask: 1 for valid output columns, 0 for slab junk cols.
    mask2d = np.zeros((Ho, Wq), np.float32)
    mask2d[:, :Wo] = 1.0
    col_mask = jnp.asarray(mask2d.reshape(M_slab, 1))

    # ------------------------------------------------------------------
    # Kernel 1: 9-tap conv-as-matmul + per-image BN partial statistics.
    # ------------------------------------------------------------------
    def conv_stats_kernel(x_ref, w_ref, m_ref, pre_ref, s1_ref, s2_ref, acc_ref):
        acc_ref[...] = jnp.zeros_like(acc_ref)
        for ky in range(3):
            for kx in range(3):
                ph = (ky % s) * s + (kx % s)
                start = (ky // s) * Wq + (kx // s)
                xs = x_ref[0, ph, start:start + M_slab, :]              # (M_slab, Kc)
                wt = w_ref[(ky * 3 + kx) * Kc:(ky * 3 + kx + 1) * Kc, :]  # (Kc, C2p)
                acc_ref[...] += jnp.dot(xs, wt, preferred_element_type=jnp.float32)
        acc = acc_ref[...] * m_ref[...]                                 # zero junk cols
        pre_ref[...] = acc.reshape(1, M_slab, C2p).astype(jnp.bfloat16)
        s1_ref[...] = jnp.sum(acc, axis=0, keepdims=True).reshape(1, 1, C2p)
        s2_ref[...] = jnp.sum(acc * acc, axis=0, keepdims=True).reshape(1, 1, C2p)

    pre, s1, s2 = pl.pallas_call(
        conv_stats_kernel,
        out_shape=(jax.ShapeDtypeStruct((N, M_slab, C2p), jnp.bfloat16),
                   jax.ShapeDtypeStruct((N, 1, C2p), jnp.float32),
                   jax.ShapeDtypeStruct((N, 1, C2p), jnp.float32)),
        grid=(N,),
        in_specs=[
            pl.BlockSpec((1, s * s, Lq, Kc), lambda n: (n, 0, 0, 0)),
            pl.BlockSpec((9 * Kc, C2p), lambda n: (0, 0)),      # weights resident
            pl.BlockSpec((M_slab, 1), lambda n: (0, 0)),        # mask resident
        ],
        out_specs=(pl.BlockSpec((1, M_slab, C2p), lambda n: (n, 0, 0)),
                   pl.BlockSpec((1, 1, C2p), lambda n: (n, 0, 0)),
                   pl.BlockSpec((1, 1, C2p), lambda n: (n, 0, 0))),
        scratch_shapes=[pltpu.VMEM((M_slab, C2p), jnp.float32)],
        compiler_params=pltpu.CompilerParams(
            dimension_semantics=("parallel",),
            vmem_limit_bytes=vmem_limit),
    )(x_flat, w, col_mask)

    # ------------------------------------------------------------------
    # Kernel 2: BN finalize (reduce image partials -> scale/shift) + ReLU.
    # NOTE: var = E[x^2]-E[x]^2 in f32 on bf16-rounded matmul outputs; fine
    # for train-mode fwd at the documented tolerance.
    # ------------------------------------------------------------------
    def bn_relu_kernel(pre_ref, s1_ref, s2_ref, gb_ref, out_ref):
        s1_all = jnp.sum(s1_ref[...], axis=0)                   # (1, C2p)
        s2_all = jnp.sum(s2_ref[...], axis=0)
        mean = s1_all * inv_m
        var = jnp.maximum(s2_all * inv_m - mean * mean, 0.0)
        gbv = gb_ref[...]
        scale = gbv[0:1, :] * lax.rsqrt(var + BN_EPS)
        shift = gbv[1:2, :] - mean * scale
        xv = pre_ref[...].astype(jnp.float32)                   # (1, M_slab, C2p)
        out_ref[...] = jnp.maximum(xv * scale[None] + shift[None],
                                   0.0).astype(jnp.bfloat16)

    y = pl.pallas_call(
        bn_relu_kernel,
        out_shape=jax.ShapeDtypeStruct((N, M_slab, C2p), jnp.bfloat16),
        grid=(N,),
        in_specs=[pl.BlockSpec((1, M_slab, C2p), lambda n: (n, 0, 0)),
                  pl.BlockSpec((N, 1, C2p), lambda n: (0, 0, 0)),
                  pl.BlockSpec((N, 1, C2p), lambda n: (0, 0, 0)),
                  pl.BlockSpec((2, C2p), lambda n: (0, 0))],
        out_specs=pl.BlockSpec((1, M_slab, C2p), lambda n: (n, 0, 0)),
        compiler_params=pltpu.CompilerParams(
            dimension_semantics=("parallel",),
            vmem_limit_bytes=vmem_limit),
    )(pre, s1, s2, gb)

    # Slice off channel padding and slab junk columns; back to NHWC.
    y = y[:, :, :C2].reshape(N, Ho, Wq, C2)[:, :, :Wo, :]
    return y


def rir_block_apply(xr, xt, layer_params, strides):
    """RiRBlock forward. xr/xt: (N,H,W,C_in) NHWC. Returns (out_r, out_t) f32."""
    x = jnp.concatenate([xr, xt], axis=-1).astype(jnp.bfloat16)
    for p, st in zip(layer_params, strides):
        x = resnet_init_apply_fused(x, p, st)
    c_out = layer_params[-1]["w_rr"].shape[-1]
    return x[..., :c_out].astype(jnp.float32), x[..., c_out:].astype(jnp.float32)


# ----------------------------------------------------------------------------
# Deterministic parameter initialization (shapes match ResnetInit.__init__)
# ----------------------------------------------------------------------------
def init_resnet_init_params(key, C_in, C_out, stride):
    keys = jax.random.split(key, 12)
    bound3 = 1.0 / np.sqrt(C_in * 9)

    def cw(k):
        return jax.random.uniform(k, (3, 3, C_in, C_out), jnp.float32, -bound3, bound3)

    def cb(k):
        return jax.random.uniform(k, (C_out,), jnp.float32, -bound3, bound3)

    p = dict(
        w_rr=cw(keys[0]), b_rr=cb(keys[1]),
        w_rt=cw(keys[2]), b_rt=cb(keys[3]),
        w_tt=cw(keys[4]), b_tt=cb(keys[5]),
        w_tr=cw(keys[6]), b_tr=cb(keys[7]),
        gamma_r=jnp.ones((C_out,), jnp.float32), beta_r=jnp.zeros((C_out,), jnp.float32),
        gamma_t=jnp.ones((C_out,), jnp.float32), beta_t=jnp.zeros((C_out,), jnp.float32),
    )
    if C_in != C_out or stride != 1:
        bound1 = 1.0 / np.sqrt(C_in)
        p["w_sc"] = jax.random.uniform(keys[8], (C_in, C_out), jnp.float32, -bound1, bound1)
        p["b_sc"] = jax.random.uniform(keys[9], (C_out,), jnp.float32, -bound1, bound1)
    else:
        p["w_sc"] = jnp.eye(C_out, dtype=jnp.float32)          # identity shortcut
        p["b_sc"] = jnp.zeros((C_out,), jnp.float32)
    return p


def init_rir_block_params(key, C_in, C_out, layer_num, stride):
    strides = [stride] + [1] * (layer_num - 1)
    params = []
    for s in strides:
        key, sub = jax.random.split(key)
        params.append(init_resnet_init_params(sub, C_in, C_out, s))
        C_in = C_out
    return params, strides


# ----------------------------------------------------------------------------
# Pure-JAX f32 reference (with biases / explicit shortcut) for correctness check
# ----------------------------------------------------------------------------
def _ref_resnet_init(xr, xt, p, stride):
    dn = ("NHWC", "HWIO", "NHWC")

    def conv3(x, w, b):
        return lax.conv_general_dilated(x, w, (stride, stride), ((1, 1), (1, 1)),
                                        dimension_numbers=dn) + b

    def bn_relu(x, gamma, beta):
        mean = jnp.mean(x, axis=(0, 1, 2), keepdims=True)
        var = jnp.mean((x - mean) ** 2, axis=(0, 1, 2), keepdims=True)
        return jnp.maximum((x - mean) * lax.rsqrt(var + BN_EPS) * gamma + beta, 0.0)

    r_r = conv3(xr, p["w_rr"], p["b_rr"])
    r_t = conv3(xr, p["w_rt"], p["b_rt"])
    t_t = conv3(xt, p["w_tt"], p["b_tt"])
    t_r = conv3(xt, p["w_tr"], p["b_tr"])
    sc = jnp.einsum("nhwc,cd->nhwd", xr[:, ::stride, ::stride, :], p["w_sc"]) + p["b_sc"]
    out_r = bn_relu(r_r + t_r + sc, p["gamma_r"], p["beta_r"])
    out_t = bn_relu(r_t + t_t, p["gamma_t"], p["beta_t"])
    return out_r, out_t


def _ref_rir_block(xr, xt, layer_params, strides):
    for p, s in zip(layer_params, strides):
        xr, xt = _ref_resnet_init(xr, xt, p, s)
    return xr, xt


# ----------------------------------------------------------------------------
if __name__ == "__main__":
    key = jax.random.PRNGKey(0)
    N, C_in, C_out, H, W = 2, 4, 8, 16, 16
    layer_num, stride = 2, 2

    k_xr, k_xt, k_p = jax.random.split(key, 3)
    x_residual = jax.random.normal(k_xr, (N, H, W, C_in), jnp.float32)
    x_transient = jax.random.normal(k_xt, (N, H, W, C_in), jnp.float32)

    layer_params, strides = init_rir_block_params(k_p, C_in, C_out, layer_num, stride)

    fwd = jax.jit(functools.partial(rir_block_apply,
                                    layer_params=layer_params, strides=strides))
    out_r, out_t = fwd(x_residual, x_transient)
    jax.block_until_ready((out_r, out_t))

    ref_r, ref_t = _ref_rir_block(x_residual, x_transient, layer_params, strides)
    # bf16 MXU inputs / bf16 intermediates -> relaxed tolerance vs f32 reference.
    np.testing.assert_allclose(np.asarray(out_r, dtype=np.float32),
                               np.asarray(ref_r, dtype=np.float32),
                               rtol=5e-2, atol=5e-2)
    np.testing.assert_allclose(np.asarray(out_t, dtype=np.float32),
                               np.asarray(ref_t, dtype=np.float32),
                               rtol=5e-2, atol=5e-2)

    print("KERNEL_OK")
</pallas_src>

<mosaic_0001>
module attributes {stable_mosaic.version = 11 : i64} {
  func.func @conv_stats_kernel(%arg0: i32, %arg1: memref<1x4x90x8xbf16, #tpu.memory_space<vmem>>, %arg2: memref<72x128xbf16, #tpu.memory_space<vmem>>, %arg3: memref<72x1xf32, #tpu.memory_space<vmem>>, %arg4: memref<1x72x128xbf16, #tpu.memory_space<vmem>>, %arg5: memref<1x1x128xf32, #tpu.memory_space<vmem>>, %arg6: memref<1x1x128xf32, #tpu.memory_space<vmem>>, %arg7: memref<72x128xf32, #tpu.memory_space<vmem>>) attributes {dimension_semantics = [#tpu.dimension_semantics<parallel>], iteration_bounds = array<i64: 2>, scalar_prefetch = 0 : i64, scratch_operands = 1 : i64, tpu.core_type = #tpu.core_type<tc>, window_params = [{transform_indices = @transform_0, window_bounds = array<i64: 1, 4, 90, 8>}, {pipeline_mode = #tpu.pipeline_mode<synchronous>, transform_indices = @transform_1, window_bounds = array<i64: 72, 128>}, {pipeline_mode = #tpu.pipeline_mode<synchronous>, transform_indices = @transform_2, window_bounds = array<i64: 72, 1>}, {transform_indices = @transform_3, window_bounds = array<i64: 1, 72, 128>}, {transform_indices = @transform_4, window_bounds = array<i64: 1, 1, 128>}, {transform_indices = @transform_5, window_bounds = array<i64: 1, 1, 128>}]} {
    %cst = arith.constant 0.000000e+00 : f32
    %0 = vector.broadcast %cst : f32 to vector<72x128xf32>
    %c0 = arith.constant 0 : index
    %c0_0 = arith.constant 0 : index
    %1 = vector.load %arg7[%c0, %c0_0] : memref<72x128xf32, #tpu.memory_space<vmem>>, vector<72x128xf32>
    tpu.vector_store %arg7[%c0, %c0_0], %0 {strides = array<i32>} : memref<72x128xf32, #tpu.memory_space<vmem>>, vector<72x128xf32>,
    %c0_1 = arith.constant 0 : index
    %c0_2 = arith.constant 0 : index
    %c0_3 = arith.constant 0 : index
    %c0_4 = arith.constant 0 : index
    %2 = vector.load %arg1[%c0_1, %c0_2, %c0_3, %c0_4] : memref<1x4x90x8xbf16, #tpu.memory_space<vmem>>, vector<1x1x72x8xbf16>
    %3 = vector.shape_cast %2 : vector<1x1x72x8xbf16> to vector<72x8xbf16>
    %c0_5 = arith.constant 0 : index
    %c0_6 = arith.constant 0 : index
    %4 = vector.load %arg2[%c0_5, %c0_6] : memref<72x128xbf16, #tpu.memory_space<vmem>>, vector<8x128xbf16>
    %c0_7 = arith.constant 0 : index
    %c0_8 = arith.constant 0 : index
    %5 = vector.load %arg7[%c0_7, %c0_8] : memref<72x128xf32, #tpu.memory_space<vmem>>, vector<72x128xf32>
    %cst_9 = arith.constant dense<0.000000e+00> : vector<72x128xf32>
    %6 = tpu.matmul %3, %4, %cst_9 {dimension_numbers = #tpu.dot_dimension_numbers<[1], [0], [0], [1], [0, 0, 1, 1], [], []>} : vector<72x8xbf16>, vector<8x128xbf16>, vector<72x128xf32> -> vector<72x128xf32>
    %7 = arith.addf %5, %6 : vector<72x128xf32>
    %c0_10 = arith.constant 0 : index
    %c0_11 = arith.constant 0 : index
    %8 = vector.load %arg7[%c0_10, %c0_11] : memref<72x128xf32, #tpu.memory_space<vmem>>, vector<72x128xf32>
    tpu.vector_store %arg7[%c0_10, %c0_11], %7 {strides = array<i32>} : memref<72x128xf32, #tpu.memory_space<vmem>>, vector<72x128xf32>,
    %c0_12 = arith.constant 0 : index
    %c1 = arith.constant 1 : index
    %c0_13 = arith.constant 0 : index
    %c0_14 = arith.constant 0 : index
    %9 = vector.load %arg1[%c0_12, %c1, %c0_13, %c0_14] : memref<1x4x90x8xbf16, #tpu.memory_space<vmem>>, vector<1x1x72x8xbf16>
    %10 = vector.shape_cast %9 : vector<1x1x72x8xbf16> to vector<72x8xbf16>
    %c8 = arith.constant 8 : index
    %c0_15 = arith.constant 0 : index
    %11 = vector.load %arg2[%c8, %c0_15] : memref<72x128xbf16, #tpu.memory_space<vmem>>, vector<8x128xbf16>
    %c0_16 = arith.constant 0 : index
    %c0_17 = arith.constant 0 : index
    %12 = vector.load %arg7[%c0_16, %c0_17] : memref<72x128xf32, #tpu.memory_space<vmem>>, vector<72x128xf32>
    %cst_18 = arith.constant dense<0.000000e+00> : vector<72x128xf32>
    %13 = tpu.matmul %10, %11, %cst_18 {dimension_numbers = #tpu.dot_dimension_numbers<[1], [0], [0], [1], [0, 0, 1, 1], [], []>} : vector<72x8xbf16>, vector<8x128xbf16>, vector<72x128xf32> -> vector<72x128xf32>
    %14 = arith.addf %12, %13 : vector<72x128xf32>
    %c0_19 = arith.constant 0 : index
    %c0_20 = arith.constant 0 : index
    %15 = vector.load %arg7[%c0_19, %c0_20] : memref<72x128xf32, #tpu.memory_space<vmem>>, vector<72x128xf32>
    tpu.vector_store %arg7[%c0_19, %c0_20], %14 {strides = array<i32>} : memref<72x128xf32, #tpu.memory_space<vmem>>, vector<72x128xf32>,
    %c0_21 = arith.constant 0 : index
    %c0_22 = arith.constant 0 : index
    %c1_23 = arith.constant 1 : index
    %c0_24 = arith.constant 0 : index
    %16 = vector.load %arg1[%c0_21, %c0_22, %c1_23, %c0_24] : memref<1x4x90x8xbf16, #tpu.memory_space<vmem>>, vector<1x1x72x8xbf16>
    %17 = vector.shape_cast %16 : vector<1x1x72x8xbf16> to vector<72x8xbf16>
    %c16 = arith.constant 16 : index
    %c0_25 = arith.constant 0 : index
    %18 = vector.load %arg2[%c16, %c0_25] : memref<72x128xbf16, #tpu.memory_space<vmem>>, vector<8x128xbf16>
    %c0_26 = arith.constant 0 : index
    %c0_27 = arith.constant 0 : index
    %19 = vector.load %arg7[%c0_26, %c0_27] : memref<72x128xf32, #tpu.memory_space<vmem>>, vector<72x128xf32>
    %cst_28 = arith.constant dense<0.000000e+00> : vector<72x128xf32>
    %20 = tpu.matmul %17, %18, %cst_28 {dimension_numbers = #tpu.dot_dimension_numbers<[1], [0], [0], [1], [0, 0, 1, 1], [], []>} : vector<72x8xbf16>, vector<8x128xbf16>, vector<72x128xf32> -> vector<72x128xf32>
    %21 = arith.addf %19, %20 : vector<72x128xf32>
    %c0_29 = arith.constant 0 : index
    %c0_30 = arith.constant 0 : index
    %22 = vector.load %arg7[%c0_29, %c0_30] : memref<72x128xf32, #tpu.memory_space<vmem>>, vector<72x128xf32>
    tpu.vector_store %arg7[%c0_29, %c0_30], %21 {strides = array<i32>} : memref<72x128xf32, #tpu.memory_space<vmem>>, vector<72x128xf32>,
    %c0_31 = arith.constant 0 : index
    %c2 = arith.constant 2 : index
    %c0_32 = arith.constant 0 : index
    %c0_33 = arith.constant 0 : index
    %23 = vector.load %arg1[%c0_31, %c2, %c0_32, %c0_33] : memref<1x4x90x8xbf16, #tpu.memory_space<vmem>>, vector<1x1x72x8xbf16>
    %24 = vector.shape_cast %23 : vector<1x1x72x8xbf16> to vector<72x8xbf16>
    %c24 = arith.constant 24 : index
    %c0_34 = arith.constant 0 : index
    %25 = vector.load %arg2[%c24, %c0_34] : memref<72x128xbf16, #tpu.memory_space<vmem>>, vector<8x128xbf16>
    %c0_35 = arith.constant 0 : index
    %c0_36 = arith.constant 0 : index
    %26 = vector.load %arg7[%c0_35, %c0_36] : memref<72x128xf32, #tpu.memory_space<vmem>>, vector<72x128xf32>
    %cst_37 = arith.constant dense<0.000000e+00> : vector<72x128xf32>
    %27 = tpu.matmul %24, %25, %cst_37 {dimension_numbers = #tpu.dot_dimension_numbers<[1], [0], [0], [1], [0, 0, 1, 1], [], []>} : vector<72x8xbf16>, vector<8x128xbf16>, vector<72x128xf32> -> vector<72x128xf32>
    %28 = arith.addf %26, %27 : vector<72x128xf32>
    %c0_38 = arith.constant 0 : index
    %c0_39 = arith.constant 0 : index
    %29 = vector.load %arg7[%c0_38, %c0_39] : memref<72x128xf32, #tpu.memory_space<vmem>>, vector<72x128xf32>
    tpu.vector_store %arg7[%c0_38, %c0_39], %28 {strides = array<i32>} : memref<72x128xf32, #tpu.memory_space<vmem>>, vector<72x128xf32>,
    %c0_40 = arith.constant 0 : index
    %c3 = arith.constant 3 : index
    %c0_41 = arith.constant 0 : index
    %c0_42 = arith.constant 0 : index
    %30 = vector.load %arg1[%c0_40, %c3, %c0_41, %c0_42] : memref<1x4x90x8xbf16, #tpu.memory_space<vmem>>, vector<1x1x72x8xbf16>
    %31 = vector.shape_cast %30 : vector<1x1x72x8xbf16> to vector<72x8xbf16>
    %c32 = arith.constant 32 : index
    %c0_43 = arith.constant 0 : index
    %32 = vector.load %arg2[%c32, %c0_43] : memref<72x128xbf16, #tpu.memory_space<vmem>>, vector<8x128xbf16>
    %c0_44 = arith.constant 0 : index
    %c0_45 = arith.constant 0 : index
    %33 = vector.load %arg7[%c0_44, %c0_45] : memref<72x128xf32, #tpu.memory_space<vmem>>, vector<72x128xf32>
    %cst_46 = arith.constant dense<0.000000e+00> : vector<72x128xf32>
    %34 = tpu.matmul %31, %32, %cst_46 {dimension_numbers = #tpu.dot_dimension_numbers<[1], [0], [0], [1], [0, 0, 1, 1], [], []>} : vector<72x8xbf16>, vector<8x128xbf16>, vector<72x128xf32> -> vector<72x128xf32>
    %35 = arith.addf %33, %34 : vector<72x128xf32>
    %c0_47 = arith.constant 0 : index
    %c0_48 = arith.constant 0 : index
    %36 = vector.load %arg7[%c0_47, %c0_48] : memref<72x128xf32, #tpu.memory_space<vmem>>, vector<72x128xf32>
    tpu.vector_store %arg7[%c0_47, %c0_48], %35 {strides = array<i32>} : memref<72x128xf32, #tpu.memory_space<vmem>>, vector<72x128xf32>,
    %c0_49 = arith.constant 0 : index
    %c2_50 = arith.constant 2 : index
    %c1_51 = arith.constant 1 : index
    %c0_52 = arith.constant 0 : index
    %37 = vector.load %arg1[%c0_49, %c2_50, %c1_51, %c0_52] : memref<1x4x90x8xbf16, #tpu.memory_space<vmem>>, vector<1x1x72x8xbf16>
    %38 = vector.shape_cast %37 : vector<1x1x72x8xbf16> to vector<72x8xbf16>
    %c40 = arith.constant 40 : index
    %c0_53 = arith.constant 0 : index
    %39 = vector.load %arg2[%c40, %c0_53] : memref<72x128xbf16, #tpu.memory_space<vmem>>, vector<8x128xbf16>
    %c0_54 = arith.constant 0 : index
    %c0_55 = arith.constant 0 : index
    %40 = vector.load %arg7[%c0_54, %c0_55] : memref<72x128xf32, #tpu.memory_space<vmem>>, vector<72x128xf32>
    %cst_56 = arith.constant dense<0.000000e+00> : vector<72x128xf32>
    %41 = tpu.matmul %38, %39, %cst_56 {dimension_numbers = #tpu.dot_dimension_numbers<[1], [0], [0], [1], [0, 0, 1, 1], [], []>} : vector<72x8xbf16>, vector<8x128xbf16>, vector<72x128xf32> -> vector<72x128xf32>
    %42 = arith.addf %40, %41 : vector<72x128xf32>
    %c0_57 = arith.constant 0 : index
    %c0_58 = arith.constant 0 : index
    %43 = vector.load %arg7[%c0_57, %c0_58] : memref<72x128xf32, #tpu.memory_space<vmem>>, vector<72x128xf32>
    tpu.vector_store %arg7[%c0_57, %c0_58], %42 {strides = array<i32>} : memref<72x128xf32, #tpu.memory_space<vmem>>, vector<72x128xf32>,
    %c0_59 = arith.constant 0 : index
    %c0_60 = arith.constant 0 : index
    %c9 = arith.constant 9 : index
    %c0_61 = arith.constant 0 : index
    %44 = vector.load %arg1[%c0_59, %c0_60, %c9, %c0_61] : memref<1x4x90x8xbf16, #tpu.memory_space<vmem>>, vector<1x1x72x8xbf16>
    %45 = vector.shape_cast %44 : vector<1x1x72x8xbf16> to vector<72x8xbf16>
    %c48 = arith.constant 48 : index
    %c0_62 = arith.constant 0 : index
    %46 = vector.load %arg2[%c48, %c0_62] : memref<72x128xbf16, #tpu.memory_space<vmem>>, vector<8x128xbf16>
    %c0_63 = arith.constant 0 : index
    %c0_64 = arith.constant 0 : index
    %47 = vector.load %arg7[%c0_63, %c0_64] : memref<72x128xf32, #tpu.memory_space<vmem>>, vector<72x128xf32>
    %cst_65 = arith.constant dense<0.000000e+00> : vector<72x128xf32>
    %48 = tpu.matmul %45, %46, %cst_65 {dimension_numbers = #tpu.dot_dimension_numbers<[1], [0], [0], [1], [0, 0, 1, 1], [], []>} : vector<72x8xbf16>, vector<8x128xbf16>, vector<72x128xf32> -> vector<72x128xf32>
    %49 = arith.addf %47, %48 : vector<72x128xf32>
    %c0_66 = arith.constant 0 : index
    %c0_67 = arith.constant 0 : index
    %50 = vector.load %arg7[%c0_66, %c0_67] : memref<72x128xf32, #tpu.memory_space<vmem>>, vector<72x128xf32>
    tpu.vector_store %arg7[%c0_66, %c0_67], %49 {strides = array<i32>} : memref<72x128xf32, #tpu.memory_space<vmem>>, vector<72x128xf32>,
    %c0_68 = arith.constant 0 : index
    %c1_69 = arith.constant 1 : index
    %c9_70 = arith.constant 9 : index
    %c0_71 = arith.constant 0 : index
    %51 = vector.load %arg1[%c0_68, %c1_69, %c9_70, %c0_71] : memref<1x4x90x8xbf16, #tpu.memory_space<vmem>>, vector<1x1x72x8xbf16>
    %52 = vector.shape_cast %51 : vector<1x1x72x8xbf16> to vector<72x8xbf16>
    %c56 = arith.constant 56 : index
    %c0_72 = arith.constant 0 : index
    %53 = vector.load %arg2[%c56, %c0_72] : memref<72x128xbf16, #tpu.memory_space<vmem>>, vector<8x128xbf16>
    %c0_73 = arith.constant 0 : index
    %c0_74 = arith.constant 0 : index
    %54 = vector.load %arg7[%c0_73, %c0_74] : memref<72x128xf32, #tpu.memory_space<vmem>>, vector<72x128xf32>
    %cst_75 = arith.constant dense<0.000000e+00> : vector<72x128xf32>
    %55 = tpu.matmul %52, %53, %cst_75 {dimension_numbers = #tpu.dot_dimension_numbers<[1], [0], [0], [1], [0, 0, 1, 1], [], []>} : vector<72x8xbf16>, vector<8x128xbf16>, vector<72x128xf32> -> vector<72x128xf32>
    %56 = arith.addf %54, %55 : vector<72x128xf32>
    %c0_76 = arith.constant 0 : index
    %c0_77 = arith.constant 0 : index
    %57 = vector.load %arg7[%c0_76, %c0_77] : memref<72x128xf32, #tpu.memory_space<vmem>>, vector<72x128xf32>
    tpu.vector_store %arg7[%c0_76, %c0_77], %56 {strides = array<i32>} : memref<72x128xf32, #tpu.memory_space<vmem>>, vector<72x128xf32>,
    %c0_78 = arith.constant 0 : index
    %c0_79 = arith.constant 0 : index
    %c10 = arith.constant 10 : index
    %c0_80 = arith.constant 0 : index
    %58 = vector.load %arg1[%c0_78, %c0_79, %c10, %c0_80] : memref<1x4x90x8xbf16, #tpu.memory_space<vmem>>, vector<1x1x72x8xbf16>
    %59 = vector.shape_cast %58 : vector<1x1x72x8xbf16> to vector<72x8xbf16>
    %c64 = arith.constant 64 : index
    %c0_81 = arith.constant 0 : index
    %60 = vector.load %arg2[%c64, %c0_81] : memref<72x128xbf16, #tpu.memory_space<vmem>>, vector<8x128xbf16>
    %c0_82 = arith.constant 0 : index
    %c0_83 = arith.constant 0 : index
    %61 = vector.load %arg7[%c0_82, %c0_83] : memref<72x128xf32, #tpu.memory_space<vmem>>, vector<72x128xf32>
    %cst_84 = arith.constant dense<0.000000e+00> : vector<72x128xf32>
    %62 = tpu.matmul %59, %60, %cst_84 {dimension_numbers = #tpu.dot_dimension_numbers<[1], [0], [0], [1], [0, 0, 1, 1], [], []>} : vector<72x8xbf16>, vector<8x128xbf16>, vector<72x128xf32> -> vector<72x128xf32>
    %63 = arith.addf %61, %62 : vector<72x128xf32>
    %c0_85 = arith.constant 0 : index
    %c0_86 = arith.constant 0 : index
    %64 = vector.load %arg7[%c0_85, %c0_86] : memref<72x128xf32, #tpu.memory_space<vmem>>, vector<72x128xf32>
    tpu.vector_store %arg7[%c0_85, %c0_86], %63 {strides = array<i32>} : memref<72x128xf32, #tpu.memory_space<vmem>>, vector<72x128xf32>,
    %c0_87 = arith.constant 0 : index
    %c0_88 = arith.constant 0 : index
    %65 = vector.load %arg7[%c0_87, %c0_88] : memref<72x128xf32, #tpu.memory_space<vmem>>, vector<72x128xf32>
    %c0_89 = arith.constant 0 : index
    %c0_90 = arith.constant 0 : index
    %66 = vector.load %arg3[%c0_89, %c0_90] : memref<72x1xf32, #tpu.memory_space<vmem>>, vector<72x1xf32>
    %67 = vector.broadcast %66 : vector<72x1xf32> to vector<72x128xf32>
    %68 = arith.mulf %65, %67 : vector<72x128xf32>
    %69 = vector.shape_cast %68 : vector<72x128xf32> to vector<1x72x128xf32>
    %70 = arith.truncf %69 : vector<1x72x128xf32> to vector<1x72x128xbf16>
    %c0_91 = arith.constant 0 : index
    %c0_92 = arith.constant 0 : index
    %c0_93 = arith.constant 0 : index
    %71 = vector.load %arg4[%c0_91, %c0_92, %c0_93] : memref<1x72x128xbf16, #tpu.memory_space<vmem>>, vector<1x72x128xbf16>
    tpu.vector_store %arg4[%c0_91, %c0_92, %c0_93], %70 {strides = array<i32>} : memref<1x72x128xbf16, #tpu.memory_space<vmem>>, vector<1x72x128xbf16>,
    %cst_94 = arith.constant dense<0.000000e+00> : vector<128xf32>
    %72 = vector.multi_reduction <add>, %68, %cst_94 [0] : vector<72x128xf32> to vector<128xf32>
    %73 = vector.shape_cast %72 : vector<128xf32> to vector<1x128xf32>
    %74 = vector.shape_cast %73 : vector<1x128xf32> to vector<1x1x128xf32>
    %c0_95 = arith.constant 0 : index
    %c0_96 = arith.constant 0 : index
    %c0_97 = arith.constant 0 : index
    %75 = vector.load %arg5[%c0_95, %c0_96, %c0_97] : memref<1x1x128xf32, #tpu.memory_space<vmem>>, vector<1x1x128xf32>
    tpu.vector_store %arg5[%c0_95, %c0_96, %c0_97], %74 {strides = array<i32>} : memref<1x1x128xf32, #tpu.memory_space<vmem>>, vector<1x1x128xf32>,
    %76 = arith.mulf %68, %68 : vector<72x128xf32>
    %cst_98 = arith.constant dense<0.000000e+00> : vector<128xf32>
    %77 = vector.multi_reduction <add>, %76, %cst_98 [0] : vector<72x128xf32> to vector<128xf32>
    %78 = vector.shape_cast %77 : vector<128xf32> to vector<1x128xf32>
    %79 = vector.shape_cast %78 : vector<1x128xf32> to vector<1x1x128xf32>
    %c0_99 = arith.constant 0 : index
    %c0_100 = arith.constant 0 : index
    %c0_101 = arith.constant 0 : index
    %80 = vector.load %arg6[%c0_99, %c0_100, %c0_101] : memref<1x1x128xf32, #tpu.memory_space<vmem>>, vector<1x1x128xf32>
    tpu.vector_store %arg6[%c0_99, %c0_100, %c0_101], %79 {strides = array<i32>} : memref<1x1x128xf32, #tpu.memory_space<vmem>>, vector<1x1x128xf32>,
    return
  }
  func.func @transform_0(%arg0: i32) -> (i32, i32, i32, i32) {
    %c0_i32 = arith.constant 0 : i32
    %c0_i32_0 = arith.constant 0 : i32
    %c0_i32_1 = arith.constant 0 : i32
    %c0_i32_2 = arith.constant 0 : i32
    return %arg0, %c0_i32, %c0_i32_0, %c0_i32_1 : i32, i32, i32, i32
  }
  func.func @transform_1(%arg0: i32) -> (i32, i32) {
    %c0_i32 = arith.constant 0 : i32
    %c0_i32_0 = arith.constant 0 : i32
    %c0_i32_1 = arith.constant 0 : i32
    return %c0_i32, %c0_i32_0 : i32, i32
  }
  func.func @transform_2(%arg0: i32) -> (i32, i32) {
    %c0_i32 = arith.constant 0 : i32
    %c0_i32_0 = arith.constant 0 : i32
    %c0_i32_1 = arith.constant 0 : i32
    return %c0_i32, %c0_i32_0 : i32, i32
  }
  func.func @transform_3(%arg0: i32) -> (i32, i32, i32) {
    %c0_i32 = arith.constant 0 : i32
    %c0_i32_0 = arith.constant 0 : i32
    %c0_i32_1 = arith.constant 0 : i32
    return %arg0, %c0_i32, %c0_i32_0 : i32, i32, i32
  }
  func.func @transform_4(%arg0: i32) -> (i32, i32, i32) {
    %c0_i32 = arith.constant 0 : i32
    %c0_i32_0 = arith.constant 0 : i32
    %c0_i32_1 = arith.constant 0 : i32
    return %arg0, %c0_i32, %c0_i32_0 : i32, i32, i32
  }
  func.func @transform_5(%arg0: i32) -> (i32, i32, i32) {
    %c0_i32 = arith.constant 0 : i32
    %c0_i32_0 = arith.constant 0 : i32
    %c0_i32_1 = arith.constant 0 : i32
    return %arg0, %c0_i32, %c0_i32_0 : i32, i32, i32
  }
}

module attributes {stable_mosaic.version = 11 : i64} {
  func.func @bn_relu_kernel(%arg0: i32, %arg1: memref<1x72x128xbf16, #tpu.memory_space<vmem>>, %arg2: memref<2x1x128xf32, #tpu.memory_space<vmem>>, %arg3: memref<2x1x128xf32, #tpu.memory_space<vmem>>, %arg4: memref<2x128xf32, #tpu.memory_space<vmem>>, %arg5: memref<1x72x128xbf16, #tpu.memory_space<vmem>>) attributes {dimension_semantics = [#tpu.dimension_semantics<parallel>], iteration_bounds = array<i64: 2>, scalar_prefetch = 0 : i64, scratch_operands = 0 : i64, tpu.core_type = #tpu.core_type<tc>, window_params = [{transform_indices = @transform_0, window_bounds = array<i64: 1, 72, 128>}, {pipeline_mode = #tpu.pipeline_mode<synchronous>, transform_indices = @transform_1, window_bounds = array<i64: 2, 1, 128>}, {pipeline_mode = #tpu.pipeline_mode<synchronous>, transform_indices = @transform_2, window_bounds = array<i64: 2, 1, 128>}, {pipeline_mode = #tpu.pipeline_mode<synchronous>, transform_indices = @transform_3, window_bounds = array<i64: 2, 128>}, {transform_indices = @transform_4, window_bounds = array<i64: 1, 72, 128>}]} {
    %c0 = arith.constant 0 : index
    %c0_0 = arith.constant 0 : index
    %c0_1 = arith.constant 0 : index
    %0 = vector.load %arg2[%c0, %c0_0, %c0_1] : memref<2x1x128xf32, #tpu.memory_space<vmem>>, vector<2x1x128xf32>
    %cst = arith.constant dense<0.000000e+00> : vector<1x128xf32>
    %1 = vector.multi_reduction <add>, %0, %cst [0] : vector<2x1x128xf32> to vector<1x128xf32>
    %c0_2 = arith.constant 0 : index
    %c0_3 = arith.constant 0 : index
    %c0_4 = arith.constant 0 : index
    %2 = vector.load %arg3[%c0_2, %c0_3, %c0_4] : memref<2x1x128xf32, #tpu.memory_space<vmem>>, vector<2x1x128xf32>
    %cst_5 = arith.constant dense<0.000000e+00> : vector<1x128xf32>
    %3 = vector.multi_reduction <add>, %2, %cst_5 [0] : vector<2x1x128xf32> to vector<1x128xf32>
    %cst_6 = arith.constant 7.812500e-03 : f32
    %4 = vector.broadcast %cst_6 : f32 to vector<1x128xf32>
    %5 = arith.mulf %1, %4 : vector<1x128xf32>
    %cst_7 = arith.constant 7.812500e-03 : f32
    %6 = vector.broadcast %cst_7 : f32 to vector<1x128xf32>
    %7 = arith.mulf %3, %6 : vector<1x128xf32>
    %8 = arith.mulf %5, %5 : vector<1x128xf32>
    %9 = arith.subf %7, %8 : vector<1x128xf32>
    %cst_8 = arith.constant 0.000000e+00 : f32
    %10 = vector.broadcast %cst_8 : f32 to vector<1x128xf32>
    %11 = arith.maximumf %9, %10 : vector<1x128xf32>
    %c0_9 = arith.constant 0 : index
    %c0_10 = arith.constant 0 : index
    %12 = vector.load %arg4[%c0_9, %c0_10] : memref<2x128xf32, #tpu.memory_space<vmem>>, vector<2x128xf32>
    %13 = vector.extract_strided_slice %12 {offsets = [0, 0], sizes = [1, 128], strides = [1, 1]} : vector<2x128xf32> to vector<1x128xf32>
    %cst_11 = arith.constant 9.99999974E-6 : f32
    %14 = vector.broadcast %cst_11 : f32 to vector<1x128xf32>
    %15 = arith.addf %11, %14 : vector<1x128xf32>
    %16 = math.rsqrt %15 : vector<1x128xf32>
    %17 = arith.mulf %13, %16 : vector<1x128xf32>
    %18 = vector.extract_strided_slice %12 {offsets = [1, 0], sizes = [1, 128], strides = [1, 1]} : vector<2x128xf32> to vector<1x128xf32>
    %19 = arith.mulf %5, %17 : vector<1x128xf32>
    %20 = arith.subf %18, %19 : vector<1x128xf32>
    %c0_12 = arith.constant 0 : index
    %c0_13 = arith.constant 0 : index
    %c0_14 = arith.constant 0 : index
    %21 = vector.load %arg1[%c0_12, %c0_13, %c0_14] : memref<1x72x128xbf16, #tpu.memory_space<vmem>>, vector<1x72x128xbf16>
    %22 = arith.extf %21 : vector<1x72x128xbf16> to vector<1x72x128xf32>
    %23 = vector.shape_cast %17 : vector<1x128xf32> to vector<1x1x128xf32>
    %24 = vector.broadcast %23 : vector<1x1x128xf32> to vector<1x72x128xf32>
    %25 = arith.mulf %22, %24 : vector<1x72x128xf32>
    %26 = vector.shape_cast %20 : vector<1x128xf32> to vector<1x1x128xf32>
    %27 = vector.broadcast %26 : vector<1x1x128xf32> to vector<1x72x128xf32>
    %28 = arith.addf %25, %27 : vector<1x72x128xf32>
    %cst_15 = arith.constant 0.000000e+00 : f32
    %29 = vector.broadcast %cst_15 : f32 to vector<1x72x128xf32>
    %30 = arith.maximumf %28, %29 : vector<1x72x128xf32>
    %31 = arith.truncf %30 : vector<1x72x128xf32> to vector<1x72x128xbf16>
    %c0_16 = arith.constant 0 : index
    %c0_17 = arith.constant 0 : index
    %c0_18 = arith.constant 0 : index
    %32 = vector.load %arg5[%c0_16, %c0_17, %c0_18] : memref<1x72x128xbf16, #tpu.memory_space<vmem>>, vector<1x72x128xbf16>
    tpu.vector_store %arg5[%c0_16, %c0_17, %c0_18], %31 {strides = array<i32>} : memref<1x72x128xbf16, #tpu.memory_space<vmem>>, vector<1x72x128xbf16>,
    return
  }
  func.func @transform_0(%arg0: i32) -> (i32, i32, i32) {
    %c0_i32 = arith.constant 0 : i32
    %c0_i32_0 = arith.constant 0 : i32
    %c0_i32_1 = arith.constant 0 : i32
    return %arg0, %c0_i32, %c0_i32_0 : i32, i32, i32
  }
  func.func @transform_1(%arg0: i32) -> (i32, i32, i32) {
    %c0_i32 = arith.constant 0 : i32
    %c0_i32_0 = arith.constant 0 : i32
    %c0_i32_1 = arith.constant 0 : i32
    %c0_i32_2 = arith.constant 0 : i32
    return %c0_i32, %c0_i32_0, %c0_i32_1 : i32, i32, i32
  }
  func.func @transform_2(%arg0: i32) -> (i32, i32, i32) {
    %c0_i32 = arith.constant 0 : i32
    %c0_i32_0 = arith.constant 0 : i32
    %c0_i32_1 = arith.constant 0 : i32
    %c0_i32_2 = arith.constant 0 : i32
    return %c0_i32, %c0_i32_0, %c0_i32_1 : i32, i32, i32
  }
  func.func @transform_3(%arg0: i32) -> (i32, i32) {
    %c0_i32 = arith.constant 0 : i32
    %c0_i32_0 = arith.constant 0 : i32
    %c0_i32_1 = arith.constant 0 : i32
    return %c0_i32, %c0_i32_0 : i32, i32
  }
  func.func @transform_4(%arg0: i32) -> (i32, i32, i32) {
    %c0_i32 = arith.constant 0 : i32
    %c0_i32_0 = arith.constant 0 : i32
    %c0_i32_1 = arith.constant 0 : i32
    return %arg0, %c0_i32, %c0_i32_0 : i32, i32, i32
  }
}

module attributes {stable_mosaic.version = 11 : i64} {
  func.func @conv_stats_kernel(%arg0: i32, %arg1: memref<1x1x110x16xbf16, #tpu.memory_space<vmem>>, %arg2: memref<144x128xbf16, #tpu.memory_space<vmem>>, %arg3: memref<80x1xf32, #tpu.memory_space<vmem>>, %arg4: memref<1x80x128xbf16, #tpu.memory_space<vmem>>, %arg5: memref<1x1x128xf32, #tpu.memory_space<vmem>>, %arg6: memref<1x1x128xf32, #tpu.memory_space<vmem>>, %arg7: memref<80x128xf32, #tpu.memory_space<vmem>>) attributes {dimension_semantics = [#tpu.dimension_semantics<parallel>], iteration_bounds = array<i64: 2>, scalar_prefetch = 0 : i64, scratch_operands = 1 : i64, tpu.core_type = #tpu.core_type<tc>, window_params = [{transform_indices = @transform_0, window_bounds = array<i64: 1, 1, 110, 16>}, {pipeline_mode = #tpu.pipeline_mode<synchronous>, transform_indices = @transform_1, window_bounds = array<i64: 144, 128>}, {pipeline_mode = #tpu.pipeline_mode<synchronous>, transform_indices = @transform_2, window_bounds = array<i64: 80, 1>}, {transform_indices = @transform_3, window_bounds = array<i64: 1, 80, 128>}, {transform_indices = @transform_4, window_bounds = array<i64: 1, 1, 128>}, {transform_indices = @transform_5, window_bounds = array<i64: 1, 1, 128>}]} {
    %cst = arith.constant 0.000000e+00 : f32
    %0 = vector.broadcast %cst : f32 to vector<80x128xf32>
    %c0 = arith.constant 0 : index
    %c0_0 = arith.constant 0 : index
    %1 = vector.load %arg7[%c0, %c0_0] : memref<80x128xf32, #tpu.memory_space<vmem>>, vector<80x128xf32>
    tpu.vector_store %arg7[%c0, %c0_0], %0 {strides = array<i32>} : memref<80x128xf32, #tpu.memory_space<vmem>>, vector<80x128xf32>,
    %c0_1 = arith.constant 0 : index
    %c0_2 = arith.constant 0 : index
    %c0_3 = arith.constant 0 : index
    %c0_4 = arith.constant 0 : index
    %2 = vector.load %arg1[%c0_1, %c0_2, %c0_3, %c0_4] : memref<1x1x110x16xbf16, #tpu.memory_space<vmem>>, vector<1x1x80x16xbf16>
    %3 = vector.shape_cast %2 : vector<1x1x80x16xbf16> to vector<80x16xbf16>
    %c0_5 = arith.constant 0 : index
    %c0_6 = arith.constant 0 : index
    %4 = vector.load %arg2[%c0_5, %c0_6] : memref<144x128xbf16, #tpu.memory_space<vmem>>, vector<16x128xbf16>
    %c0_7 = arith.constant 0 : index
    %c0_8 = arith.constant 0 : index
    %5 = vector.load %arg7[%c0_7, %c0_8] : memref<80x128xf32, #tpu.memory_space<vmem>>, vector<80x128xf32>
    %cst_9 = arith.constant dense<0.000000e+00> : vector<80x128xf32>
    %6 = tpu.matmul %3, %4, %cst_9 {dimension_numbers = #tpu.dot_dimension_numbers<[1], [0], [0], [1], [0, 0, 1, 1], [], []>} : vector<80x16xbf16>, vector<16x128xbf16>, vector<80x128xf32> -> vector<80x128xf32>
    %7 = arith.addf %5, %6 : vector<80x128xf32>
    %c0_10 = arith.constant 0 : index
    %c0_11 = arith.constant 0 : index
    %8 = vector.load %arg7[%c0_10, %c0_11] : memref<80x128xf32, #tpu.memory_space<vmem>>, vector<80x128xf32>
    tpu.vector_store %arg7[%c0_10, %c0_11], %7 {strides = array<i32>} : memref<80x128xf32, #tpu.memory_space<vmem>>, vector<80x128xf32>,
    %c0_12 = arith.constant 0 : index
    %c0_13 = arith.constant 0 : index
    %c1 = arith.constant 1 : index
    %c0_14 = arith.constant 0 : index
    %9 = vector.load %arg1[%c0_12, %c0_13, %c1, %c0_14] : memref<1x1x110x16xbf16, #tpu.memory_space<vmem>>, vector<1x1x80x16xbf16>
    %10 = vector.shape_cast %9 : vector<1x1x80x16xbf16> to vector<80x16xbf16>
    %c16 = arith.constant 16 : index
    %c0_15 = arith.constant 0 : index
    %11 = vector.load %arg2[%c16, %c0_15] : memref<144x128xbf16, #tpu.memory_space<vmem>>, vector<16x128xbf16>
    %c0_16 = arith.constant 0 : index
    %c0_17 = arith.constant 0 : index
    %12 = vector.load %arg7[%c0_16, %c0_17] : memref<80x128xf32, #tpu.memory_space<vmem>>, vector<80x128xf32>
    %cst_18 = arith.constant dense<0.000000e+00> : vector<80x128xf32>
    %13 = tpu.matmul %10, %11, %cst_18 {dimension_numbers = #tpu.dot_dimension_numbers<[1], [0], [0], [1], [0, 0, 1, 1], [], []>} : vector<80x16xbf16>, vector<16x128xbf16>, vector<80x128xf32> -> vector<80x128xf32>
    %14 = arith.addf %12, %13 : vector<80x128xf32>
    %c0_19 = arith.constant 0 : index
    %c0_20 = arith.constant 0 : index
    %15 = vector.load %arg7[%c0_19, %c0_20] : memref<80x128xf32, #tpu.memory_space<vmem>>, vector<80x128xf32>
    tpu.vector_store %arg7[%c0_19, %c0_20], %14 {strides = array<i32>} : memref<80x128xf32, #tpu.memory_space<vmem>>, vector<80x128xf32>,
    %c0_21 = arith.constant 0 : index
    %c0_22 = arith.constant 0 : index
    %c2 = arith.constant 2 : index
    %c0_23 = arith.constant 0 : index
    %16 = vector.load %arg1[%c0_21, %c0_22, %c2, %c0_23] : memref<1x1x110x16xbf16, #tpu.memory_space<vmem>>, vector<1x1x80x16xbf16>
    %17 = vector.shape_cast %16 : vector<1x1x80x16xbf16> to vector<80x16xbf16>
    %c32 = arith.constant 32 : index
    %c0_24 = arith.constant 0 : index
    %18 = vector.load %arg2[%c32, %c0_24] : memref<144x128xbf16, #tpu.memory_space<vmem>>, vector<16x128xbf16>
    %c0_25 = arith.constant 0 : index
    %c0_26 = arith.constant 0 : index
    %19 = vector.load %arg7[%c0_25, %c0_26] : memref<80x128xf32, #tpu.memory_space<vmem>>, vector<80x128xf32>
    %cst_27 = arith.constant dense<0.000000e+00> : vector<80x128xf32>
    %20 = tpu.matmul %17, %18, %cst_27 {dimension_numbers = #tpu.dot_dimension_numbers<[1], [0], [0], [1], [0, 0, 1, 1], [], []>} : vector<80x16xbf16>, vector<16x128xbf16>, vector<80x128xf32> -> vector<80x128xf32>
    %21 = arith.addf %19, %20 : vector<80x128xf32>
    %c0_28 = arith.constant 0 : index
    %c0_29 = arith.constant 0 : index
    %22 = vector.load %arg7[%c0_28, %c0_29] : memref<80x128xf32, #tpu.memory_space<vmem>>, vector<80x128xf32>
    tpu.vector_store %arg7[%c0_28, %c0_29], %21 {strides = array<i32>} : memref<80x128xf32, #tpu.memory_space<vmem>>, vector<80x128xf32>,
    %c0_30 = arith.constant 0 : index
    %c0_31 = arith.constant 0 : index
    %c10 = arith.constant 10 : index
    %c0_32 = arith.constant 0 : index
    %23 = vector.load %arg1[%c0_30, %c0_31, %c10, %c0_32] : memref<1x1x110x16xbf16, #tpu.memory_space<vmem>>, vector<1x1x80x16xbf16>
    %24 = vector.shape_cast %23 : vector<1x1x80x16xbf16> to vector<80x16xbf16>
    %c48 = arith.constant 48 : index
    %c0_33 = arith.constant 0 : index
    %25 = vector.load %arg2[%c48, %c0_33] : memref<144x128xbf16, #tpu.memory_space<vmem>>, vector<16x128xbf16>
    %c0_34 = arith.constant 0 : index
    %c0_35 = arith.constant 0 : index
    %26 = vector.load %arg7[%c0_34, %c0_35] : memref<80x128xf32, #tpu.memory_space<vmem>>, vector<80x128xf32>
    %cst_36 = arith.constant dense<0.000000e+00> : vector<80x128xf32>
    %27 = tpu.matmul %24, %25, %cst_36 {dimension_numbers = #tpu.dot_dimension_numbers<[1], [0], [0], [1], [0, 0, 1, 1], [], []>} : vector<80x16xbf16>, vector<16x128xbf16>, vector<80x128xf32> -> vector<80x128xf32>
    %28 = arith.addf %26, %27 : vector<80x128xf32>
    %c0_37 = arith.constant 0 : index
    %c0_38 = arith.constant 0 : index
    %29 = vector.load %arg7[%c0_37, %c0_38] : memref<80x128xf32, #tpu.memory_space<vmem>>, vector<80x128xf32>
    tpu.vector_store %arg7[%c0_37, %c0_38], %28 {strides = array<i32>} : memref<80x128xf32, #tpu.memory_space<vmem>>, vector<80x128xf32>,
    %c0_39 = arith.constant 0 : index
    %c0_40 = arith.constant 0 : index
    %c11 = arith.constant 11 : index
    %c0_41 = arith.constant 0 : index
    %30 = vector.load %arg1[%c0_39, %c0_40, %c11, %c0_41] : memref<1x1x110x16xbf16, #tpu.memory_space<vmem>>, vector<1x1x80x16xbf16>
    %31 = vector.shape_cast %30 : vector<1x1x80x16xbf16> to vector<80x16xbf16>
    %c64 = arith.constant 64 : index
    %c0_42 = arith.constant 0 : index
    %32 = vector.load %arg2[%c64, %c0_42] : memref<144x128xbf16, #tpu.memory_space<vmem>>, vector<16x128xbf16>
    %c0_43 = arith.constant 0 : index
    %c0_44 = arith.constant 0 : index
    %33 = vector.load %arg7[%c0_43, %c0_44] : memref<80x128xf32, #tpu.memory_space<vmem>>, vector<80x128xf32>
    %cst_45 = arith.constant dense<0.000000e+00> : vector<80x128xf32>
    %34 = tpu.matmul %31, %32, %cst_45 {dimension_numbers = #tpu.dot_dimension_numbers<[1], [0], [0], [1], [0, 0, 1, 1], [], []>} : vector<80x16xbf16>, vector<16x128xbf16>, vector<80x128xf32> -> vector<80x128xf32>
    %35 = arith.addf %33, %34 : vector<80x128xf32>
    %c0_46 = arith.constant 0 : index
    %c0_47 = arith.constant 0 : index
    %36 = vector.load %arg7[%c0_46, %c0_47] : memref<80x128xf32, #tpu.memory_space<vmem>>, vector<80x128xf32>
    tpu.vector_store %arg7[%c0_46, %c0_47], %35 {strides = array<i32>} : memref<80x128xf32, #tpu.memory_space<vmem>>, vector<80x128xf32>,
    %c0_48 = arith.constant 0 : index
    %c0_49 = arith.constant 0 : index
    %c12 = arith.constant 12 : index
    %c0_50 = arith.constant 0 : index
    %37 = vector.load %arg1[%c0_48, %c0_49, %c12, %c0_50] : memref<1x1x110x16xbf16, #tpu.memory_space<vmem>>, vector<1x1x80x16xbf16>
    %38 = vector.shape_cast %37 : vector<1x1x80x16xbf16> to vector<80x16xbf16>
    %c80 = arith.constant 80 : index
    %c0_51 = arith.constant 0 : index
    %39 = vector.load %arg2[%c80, %c0_51] : memref<144x128xbf16, #tpu.memory_space<vmem>>, vector<16x128xbf16>
    %c0_52 = arith.constant 0 : index
    %c0_53 = arith.constant 0 : index
    %40 = vector.load %arg7[%c0_52, %c0_53] : memref<80x128xf32, #tpu.memory_space<vmem>>, vector<80x128xf32>
    %cst_54 = arith.constant dense<0.000000e+00> : vector<80x128xf32>
    %41 = tpu.matmul %38, %39, %cst_54 {dimension_numbers = #tpu.dot_dimension_numbers<[1], [0], [0], [1], [0, 0, 1, 1], [], []>} : vector<80x16xbf16>, vector<16x128xbf16>, vector<80x128xf32> -> vector<80x128xf32>
    %42 = arith.addf %40, %41 : vector<80x128xf32>
    %c0_55 = arith.constant 0 : index
    %c0_56 = arith.constant 0 : index
    %43 = vector.load %arg7[%c0_55, %c0_56] : memref<80x128xf32, #tpu.memory_space<vmem>>, vector<80x128xf32>
    tpu.vector_store %arg7[%c0_55, %c0_56], %42 {strides = array<i32>} : memref<80x128xf32, #tpu.memory_space<vmem>>, vector<80x128xf32>,
    %c0_57 = arith.constant 0 : index
    %c0_58 = arith.constant 0 : index
    %c20 = arith.constant 20 : index
    %c0_59 = arith.constant 0 : index
    %44 = vector.load %arg1[%c0_57, %c0_58, %c20, %c0_59] : memref<1x1x110x16xbf16, #tpu.memory_space<vmem>>, vector<1x1x80x16xbf16>
    %45 = vector.shape_cast %44 : vector<1x1x80x16xbf16> to vector<80x16xbf16>
    %c96 = arith.constant 96 : index
    %c0_60 = arith.constant 0 : index
    %46 = vector.load %arg2[%c96, %c0_60] : memref<144x128xbf16, #tpu.memory_space<vmem>>, vector<16x128xbf16>
    %c0_61 = arith.constant 0 : index
    %c0_62 = arith.constant 0 : index
    %47 = vector.load %arg7[%c0_61, %c0_62] : memref<80x128xf32, #tpu.memory_space<vmem>>, vector<80x128xf32>
    %cst_63 = arith.constant dense<0.000000e+00> : vector<80x128xf32>
    %48 = tpu.matmul %45, %46, %cst_63 {dimension_numbers = #tpu.dot_dimension_numbers<[1], [0], [0], [1], [0, 0, 1, 1], [], []>} : vector<80x16xbf16>, vector<16x128xbf16>, vector<80x128xf32> -> vector<80x128xf32>
    %49 = arith.addf %47, %48 : vector<80x128xf32>
    %c0_64 = arith.constant 0 : index
    %c0_65 = arith.constant 0 : index
    %50 = vector.load %arg7[%c0_64, %c0_65] : memref<80x128xf32, #tpu.memory_space<vmem>>, vector<80x128xf32>
    tpu.vector_store %arg7[%c0_64, %c0_65], %49 {strides = array<i32>} : memref<80x128xf32, #tpu.memory_space<vmem>>, vector<80x128xf32>,
    %c0_66 = arith.constant 0 : index
    %c0_67 = arith.constant 0 : index
    %c21 = arith.constant 21 : index
    %c0_68 = arith.constant 0 : index
    %51 = vector.load %arg1[%c0_66, %c0_67, %c21, %c0_68] : memref<1x1x110x16xbf16, #tpu.memory_space<vmem>>, vector<1x1x80x16xbf16>
    %52 = vector.shape_cast %51 : vector<1x1x80x16xbf16> to vector<80x16xbf16>
    %c112 = arith.constant 112 : index
    %c0_69 = arith.constant 0 : index
    %53 = vector.load %arg2[%c112, %c0_69] : memref<144x128xbf16, #tpu.memory_space<vmem>>, vector<16x128xbf16>
    %c0_70 = arith.constant 0 : index
    %c0_71 = arith.constant 0 : index
    %54 = vector.load %arg7[%c0_70, %c0_71] : memref<80x128xf32, #tpu.memory_space<vmem>>, vector<80x128xf32>
    %cst_72 = arith.constant dense<0.000000e+00> : vector<80x128xf32>
    %55 = tpu.matmul %52, %53, %cst_72 {dimension_numbers = #tpu.dot_dimension_numbers<[1], [0], [0], [1], [0, 0, 1, 1], [], []>} : vector<80x16xbf16>, vector<16x128xbf16>, vector<80x128xf32> -> vector<80x128xf32>
    %56 = arith.addf %54, %55 : vector<80x128xf32>
    %c0_73 = arith.constant 0 : index
    %c0_74 = arith.constant 0 : index
    %57 = vector.load %arg7[%c0_73, %c0_74] : memref<80x128xf32, #tpu.memory_space<vmem>>, vector<80x128xf32>
    tpu.vector_store %arg7[%c0_73, %c0_74], %56 {strides = array<i32>} : memref<80x128xf32, #tpu.memory_space<vmem>>, vector<80x128xf32>,
    %c0_75 = arith.constant 0 : index
    %c0_76 = arith.constant 0 : index
    %c22 = arith.constant 22 : index
    %c0_77 = arith.constant 0 : index
    %58 = vector.load %arg1[%c0_75, %c0_76, %c22, %c0_77] : memref<1x1x110x16xbf16, #tpu.memory_space<vmem>>, vector<1x1x80x16xbf16>
    %59 = vector.shape_cast %58 : vector<1x1x80x16xbf16> to vector<80x16xbf16>
    %c128 = arith.constant 128 : index
    %c0_78 = arith.constant 0 : index
    %60 = vector.load %arg2[%c128, %c0_78] : memref<144x128xbf16, #tpu.memory_space<vmem>>, vector<16x128xbf16>
    %c0_79 = arith.constant 0 : index
    %c0_80 = arith.constant 0 : index
    %61 = vector.load %arg7[%c0_79, %c0_80] : memref<80x128xf32, #tpu.memory_space<vmem>>, vector<80x128xf32>
    %cst_81 = arith.constant dense<0.000000e+00> : vector<80x128xf32>
    %62 = tpu.matmul %59, %60, %cst_81 {dimension_numbers = #tpu.dot_dimension_numbers<[1], [0], [0], [1], [0, 0, 1, 1], [], []>} : vector<80x16xbf16>, vector<16x128xbf16>, vector<80x128xf32> -> vector<80x128xf32>
    %63 = arith.addf %61, %62 : vector<80x128xf32>
    %c0_82 = arith.constant 0 : index
    %c0_83 = arith.constant 0 : index
    %64 = vector.load %arg7[%c0_82, %c0_83] : memref<80x128xf32, #tpu.memory_space<vmem>>, vector<80x128xf32>
    tpu.vector_store %arg7[%c0_82, %c0_83], %63 {strides = array<i32>} : memref<80x128xf32, #tpu.memory_space<vmem>>, vector<80x128xf32>,
    %c0_84 = arith.constant 0 : index
    %c0_85 = arith.constant 0 : index
    %65 = vector.load %arg7[%c0_84, %c0_85] : memref<80x128xf32, #tpu.memory_space<vmem>>, vector<80x128xf32>
    %c0_86 = arith.constant 0 : index
    %c0_87 = arith.constant 0 : index
    %66 = vector.load %arg3[%c0_86, %c0_87] : memref<80x1xf32, #tpu.memory_space<vmem>>, vector<80x1xf32>
    %67 = vector.broadcast %66 : vector<80x1xf32> to vector<80x128xf32>
    %68 = arith.mulf %65, %67 : vector<80x128xf32>
    %69 = vector.shape_cast %68 : vector<80x128xf32> to vector<1x80x128xf32>
    %70 = arith.truncf %69 : vector<1x80x128xf32> to vector<1x80x128xbf16>
    %c0_88 = arith.constant 0 : index
    %c0_89 = arith.constant 0 : index
    %c0_90 = arith.constant 0 : index
    %71 = vector.load %arg4[%c0_88, %c0_89, %c0_90] : memref<1x80x128xbf16, #tpu.memory_space<vmem>>, vector<1x80x128xbf16>
    tpu.vector_store %arg4[%c0_88, %c0_89, %c0_90], %70 {strides = array<i32>} : memref<1x80x128xbf16, #tpu.memory_space<vmem>>, vector<1x80x128xbf16>,
    %cst_91 = arith.constant dense<0.000000e+00> : vector<128xf32>
    %72 = vector.multi_reduction <add>, %68, %cst_91 [0] : vector<80x128xf32> to vector<128xf32>
    %73 = vector.shape_cast %72 : vector<128xf32> to vector<1x128xf32>
    %74 = vector.shape_cast %73 : vector<1x128xf32> to vector<1x1x128xf32>
    %c0_92 = arith.constant 0 : index
    %c0_93 = arith.constant 0 : index
    %c0_94 = arith.constant 0 : index
    %75 = vector.load %arg5[%c0_92, %c0_93, %c0_94] : memref<1x1x128xf32, #tpu.memory_space<vmem>>, vector<1x1x128xf32>
    tpu.vector_store %arg5[%c0_92, %c0_93, %c0_94], %74 {strides = array<i32>} : memref<1x1x128xf32, #tpu.memory_space<vmem>>, vector<1x1x128xf32>,
    %76 = arith.mulf %68, %68 : vector<80x128xf32>
    %cst_95 = arith.constant dense<0.000000e+00> : vector<128xf32>
    %77 = vector.multi_reduction <add>, %76, %cst_95 [0] : vector<80x128xf32> to vector<128xf32>
    %78 = vector.shape_cast %77 : vector<128xf32> to vector<1x128xf32>
    %79 = vector.shape_cast %78 : vector<1x128xf32> to vector<1x1x128xf32>
    %c0_96 = arith.constant 0 : index
    %c0_97 = arith.constant 0 : index
    %c0_98 = arith.constant 0 : index
    %80 = vector.load %arg6[%c0_96, %c0_97, %c0_98] : memref<1x1x128xf32, #tpu.memory_space<vmem>>, vector<1x1x128xf32>
    tpu.vector_store %arg6[%c0_96, %c0_97, %c0_98], %79 {strides = array<i32>} : memref<1x1x128xf32, #tpu.memory_space<vmem>>, vector<1x1x128xf32>,
    return
  }
  func.func @transform_0(%arg0: i32) -> (i32, i32, i32, i32) {
    %c0_i32 = arith.constant 0 : i32
    %c0_i32_0 = arith.constant 0 : i32
    %c0_i32_1 = arith.constant 0 : i32
    %c0_i32_2 = arith.constant 0 : i32
    return %arg0, %c0_i32, %c0_i32_0, %c0_i32_1 : i32, i32, i32, i32
  }
  func.func @transform_1(%arg0: i32) -> (i32, i32) {
    %c0_i32 = arith.constant 0 : i32
    %c0_i32_0 = arith.constant 0 : i32
    %c0_i32_1 = arith.constant 0 : i32
    return %c0_i32, %c0_i32_0 : i32, i32
  }
  func.func @transform_2(%arg0: i32) -> (i32, i32) {
    %c0_i32 = arith.constant 0 : i32
    %c0_i32_0 = arith.constant 0 : i32
    %c0_i32_1 = arith.constant 0 : i32
    return %c0_i32, %c0_i32_0 : i32, i32
  }
  func.func @transform_3(%arg0: i32) -> (i32, i32, i32) {
    %c0_i32 = arith.constant 0 : i32
    %c0_i32_0 = arith.constant 0 : i32
    %c0_i32_1 = arith.constant 0 : i32
    return %arg0, %c0_i32, %c0_i32_0 : i32, i32, i32
  }
  func.func @transform_4(%arg0: i32) -> (i32, i32, i32) {
    %c0_i32 = arith.constant 0 : i32
    %c0_i32_0 = arith.constant 0 : i32
    %c0_i32_1 = arith.constant 0 : i32
    return %arg0, %c0_i32, %c0_i32_0 : i32, i32, i32
  }
  func.func @transform_5(%arg0: i32) -> (i32, i32, i32) {
    %c0_i32 = arith.constant 0 : i32
    %c0_i32_0 = arith.constant 0 : i32
    %c0_i32_1 = arith.constant 0 : i32
    return %arg0, %c0_i32, %c0_i32_0 : i32, i32, i32
  }
}

module attributes {stable_mosaic.version = 11 : i64} {
  func.func @bn_relu_kernel(%arg0: i32, %arg1: memref<1x80x128xbf16, #tpu.memory_space<vmem>>, %arg2: memref<2x1x128xf32, #tpu.memory_space<vmem>>, %arg3: memref<2x1x128xf32, #tpu.memory_space<vmem>>, %arg4: memref<2x128xf32, #tpu.memory_space<vmem>>, %arg5: memref<1x80x128xbf16, #tpu.memory_space<vmem>>) attributes {dimension_semantics = [#tpu.dimension_semantics<parallel>], iteration_bounds = array<i64: 2>, scalar_prefetch = 0 : i64, scratch_operands = 0 : i64, tpu.core_type = #tpu.core_type<tc>, window_params = [{transform_indices = @transform_0, window_bounds = array<i64: 1, 80, 128>}, {pipeline_mode = #tpu.pipeline_mode<synchronous>, transform_indices = @transform_1, window_bounds = array<i64: 2, 1, 128>}, {pipeline_mode = #tpu.pipeline_mode<synchronous>, transform_indices = @transform_2, window_bounds = array<i64: 2, 1, 128>}, {pipeline_mode = #tpu.pipeline_mode<synchronous>, transform_indices = @transform_3, window_bounds = array<i64: 2, 128>}, {transform_indices = @transform_4, window_bounds = array<i64: 1, 80, 128>}]} {
    %c0 = arith.constant 0 : index
    %c0_0 = arith.constant 0 : index
    %c0_1 = arith.constant 0 : index
    %0 = vector.load %arg2[%c0, %c0_0, %c0_1] : memref<2x1x128xf32, #tpu.memory_space<vmem>>, vector<2x1x128xf32>
    %cst = arith.constant dense<0.000000e+00> : vector<1x128xf32>
    %1 = vector.multi_reduction <add>, %0, %cst [0] : vector<2x1x128xf32> to vector<1x128xf32>
    %c0_2 = arith.constant 0 : index
    %c0_3 = arith.constant 0 : index
    %c0_4 = arith.constant 0 : index
    %2 = vector.load %arg3[%c0_2, %c0_3, %c0_4] : memref<2x1x128xf32, #tpu.memory_space<vmem>>, vector<2x1x128xf32>
    %cst_5 = arith.constant dense<0.000000e+00> : vector<1x128xf32>
    %3 = vector.multi_reduction <add>, %2, %cst_5 [0] : vector<2x1x128xf32> to vector<1x128xf32>
    %cst_6 = arith.constant 7.812500e-03 : f32
    %4 = vector.broadcast %cst_6 : f32 to vector<1x128xf32>
    %5 = arith.mulf %1, %4 : vector<1x128xf32>
    %cst_7 = arith.constant 7.812500e-03 : f32
    %6 = vector.broadcast %cst_7 : f32 to vector<1x128xf32>
    %7 = arith.mulf %3, %6 : vector<1x128xf32>
    %8 = arith.mulf %5, %5 : vector<1x128xf32>
    %9 = arith.subf %7, %8 : vector<1x128xf32>
    %cst_8 = arith.constant 0.000000e+00 : f32
    %10 = vector.broadcast %cst_8 : f32 to vector<1x128xf32>
    %11 = arith.maximumf %9, %10 : vector<1x128xf32>
    %c0_9 = arith.constant 0 : index
    %c0_10 = arith.constant 0 : index
    %12 = vector.load %arg4[%c0_9, %c0_10] : memref<2x128xf32, #tpu.memory_space<vmem>>, vector<2x128xf32>
    %13 = vector.extract_strided_slice %12 {offsets = [0, 0], sizes = [1, 128], strides = [1, 1]} : vector<2x128xf32> to vector<1x128xf32>
    %cst_11 = arith.constant 9.99999974E-6 : f32
    %14 = vector.broadcast %cst_11 : f32 to vector<1x128xf32>
    %15 = arith.addf %11, %14 : vector<1x128xf32>
    %16 = math.rsqrt %15 : vector<1x128xf32>
    %17 = arith.mulf %13, %16 : vector<1x128xf32>
    %18 = vector.extract_strided_slice %12 {offsets = [1, 0], sizes = [1, 128], strides = [1, 1]} : vector<2x128xf32> to vector<1x128xf32>
    %19 = arith.mulf %5, %17 : vector<1x128xf32>
    %20 = arith.subf %18, %19 : vector<1x128xf32>
    %c0_12 = arith.constant 0 : index
    %c0_13 = arith.constant 0 : index
    %c0_14 = arith.constant 0 : index
    %21 = vector.load %arg1[%c0_12, %c0_13, %c0_14] : memref<1x80x128xbf16, #tpu.memory_space<vmem>>, vector<1x80x128xbf16>
    %22 = arith.extf %21 : vector<1x80x128xbf16> to vector<1x80x128xf32>
    %23 = vector.shape_cast %17 : vector<1x128xf32> to vector<1x1x128xf32>
    %24 = vector.broadcast %23 : vector<1x1x128xf32> to vector<1x80x128xf32>
    %25 = arith.mulf %22, %24 : vector<1x80x128xf32>
    %26 = vector.shape_cast %20 : vector<1x128xf32> to vector<1x1x128xf32>
    %27 = vector.broadcast %26 : vector<1x1x128xf32> to vector<1x80x128xf32>
    %28 = arith.addf %25, %27 : vector<1x80x128xf32>
    %cst_15 = arith.constant 0.000000e+00 : f32
    %29 = vector.broadcast %cst_15 : f32 to vector<1x80x128xf32>
    %30 = arith.maximumf %28, %29 : vector<1x80x128xf32>
    %31 = arith.truncf %30 : vector<1x80x128xf32> to vector<1x80x128xbf16>
    %c0_16 = arith.constant 0 : index
    %c0_17 = arith.constant 0 : index
    %c0_18 = arith.constant 0 : index
    %32 = vector.load %arg5[%c0_16, %c0_17, %c0_18] : memref<1x80x128xbf16, #tpu.memory_space<vmem>>, vector<1x80x128xbf16>
    tpu.vector_store %arg5[%c0_16, %c0_17, %c0_18], %31 {strides = array<i32>} : memref<1x80x128xbf16, #tpu.memory_space<vmem>>, vector<1x80x128xbf16>,
    return
  }
  func.func @transform_0(%arg0: i32) -> (i32, i32, i32) {
    %c0_i32 = arith.constant 0 : i32
    %c0_i32_0 = arith.constant 0 : i32
    %c0_i32_1 = arith.constant 0 : i32
    return %arg0, %c0_i32, %c0_i32_0 : i32, i32, i32
  }
  func.func @transform_1(%arg0: i32) -> (i32, i32, i32) {
    %c0_i32 = arith.constant 0 : i32
    %c0_i32_0 = arith.constant 0 : i32
    %c0_i32_1 = arith.constant 0 : i32
    %c0_i32_2 = arith.constant 0 : i32
    return %c0_i32, %c0_i32_0, %c0_i32_1 : i32, i32, i32
  }
  func.func @transform_2(%arg0: i32) -> (i32, i32, i32) {
    %c0_i32 = arith.constant 0 : i32
    %c0_i32_0 = arith.constant 0 : i32
    %c0_i32_1 = arith.constant 0 : i32
    %c0_i32_2 = arith.constant 0 : i32
    return %c0_i32, %c0_i32_0, %c0_i32_1 : i32, i32, i32
  }
  func.func @transform_3(%arg0: i32) -> (i32, i32) {
    %c0_i32 = arith.constant 0 : i32
    %c0_i32_0 = arith.constant 0 : i32
    %c0_i32_1 = arith.constant 0 : i32
    return %c0_i32, %c0_i32_0 : i32, i32
  }
  func.func @transform_4(%arg0: i32) -> (i32, i32, i32) {
    %c0_i32 = arith.constant 0 : i32
    %c0_i32_0 = arith.constant 0 : i32
    %c0_i32_1 = arith.constant 0 : i32
    return %arg0, %c0_i32, %c0_i32_0 : i32, i32, i32
  }
}

</mosaic_0001>

<bundles_post_ra>
// kernel: rir_block_apply.5
= control target key start
LH: loop header
LB: loop body
LE: loop exit
PB: predicated region body
PF: predicated region fallthrough
CT: control target
= control target key end

     0   :  { %s490_s15 = smov 0   ;;  %s529_s0 = inlined_call_operand.vmem [shape: bf16[2,72,128], index: 0, kind: input, shape index: {}]   ;;  %s530_s1 = inlined_call_operand.vmem [shape: f32[2,1,128], index: 1, kind: input, shape index: {}]   ;;  %s531_s2 = inlined_call_operand.vmem [shape: f32[2,1,128], index: 2, kind: input, shape index: {}]   ;;  %s532_s3 = inlined_call_operand.vmem [shape: f32[2,128], index: 3, kind: input, shape index: {}]   ;;  %s533_s4 = inlined_call_operand.vmem [shape: bf16[2,72,128], index: 4, kind: output, shape index: {}]  }
   0x1 LB: > { %s377_s16 = sadd.s32 4294967295, %s463_s15   ;;  %p381_p0 = scmp.ge.s32.totalorder %s463_s15, 1  ;;  %s463_s15 = sphi %s490_s15, %s14_s15  }
   0x2   : > { %p162_p1 = scmp.lt.s32.totalorder %s463_s15, 3 }
   0x4   : > { %p163_p2 = pnand %p381_p0, %p162_p1 }
   0x5   : > { %v198_v0 = vld [vmem:[%s530_s1] sm:$0x1] (!%p163_p2)  ;;  %v199_v1 = vld [vmem:[%s530_s1 + $0x1] sm:$0x1] (!%p163_p2)  ;;  %vm200_vm0 = vcmask (!%p163_p2), 1040384   ;;  %p188_p3 = scmp.lt.s32.totalorder (!%p163_p2), %s377_s16, 1  ;;  %v241_v16 = vlaneseq (!%p163_p2) }
   0x6   : > { %166 = sbr.rel (%p163_p2) target bundleno = 51 (0x33), region = 36  ;;  %v201_v2 = vsel (!%p163_p2), %vm200_vm0, %v198_v0, 0.0  ;;  %v202_v3 = vsel (!%p163_p2), %vm200_vm0, %v199_v1, 0.0  ;;  %v204_v4 = vld [vmem:[%s531_s2] sm:$0x1] (!%p163_p2) }
   0x7   : > { %v205_v5 = vld [vmem:[%s531_s2 + $0x1] sm:$0x1] (!%p163_p2)  ;;  %v203_v6 = vadd.f32 (!%p163_p2), %v202_v3, %v201_v2  ;;  %v206_v7 = vsel (!%p163_p2), %vm200_vm0, %v204_v4, 0.0  ;;  %v242_v17 = vshrl.u32 (!%p163_p2), %v241_v16, 7 }
   0x8   : > { %v207_v8 = vsel (!%p163_p2), %vm200_vm0, %v205_v5, 0.0  ;;  %v214_v18 = vld [vmem:[%s532_s3] sm:$0x3] (!%p163_p2) }
   0x9   : > { %v208_v9 = vadd.f32 (!%p163_p2), %v207_v8, %v206_v7  ;;  %v209_v10 = vmul.f32 (!%p163_p2), 0.0078125, %v203_v6  ;;  %v243_v20 = vsub.s32 (!%p163_p2), 0, %v242_v17  ;;  %v256_v38 = vsub.s32 (!%p163_p2), 1, %v242_v17 }
   0xb   : > { %v210_v11 = vmul.f32 (!%p163_p2), 0.0078125, %v208_v9  ;;  %v211_v12 = vmul.f32 (!%p163_p2), %v209_v10, %v209_v10 }
   0xd   : > { %v212_v13 = vsub.f32 %v210_v11, %v211_v12  ;;  %s535_s16 = smov (!%p188_p3, %s377_s16), 1 }
   0xe   : > { %s446_s25 = smul.u32 36, %s535_s16 }
   0xf   : > { %v213_v14 = vmax.f32 %v212_v13, 0.0 }
  0x10   : > { %s192_s28 = scalar_lea.vmem %s529_s0, %s446_s25  ;;  %s197_s7 = scalar_lea.vmem %s533_s4, %s446_s25 }
  0x11   : > { %v215_v15 = vadd.f32 1e-05, %v213_v14  ;;  %v405_v19 = vld [vmem:[%s192_s28] sm:$0xff]   ;;  %v440_v22 = vld [vmem:[%s192_s28 + $0x8] sm:$0xff]   ;;  %v441_v24 = vld [vmem:[%s192_s28 + $0x10] sm:$0xff]  }
  0x12   : > { %v442_v25 = vld [vmem:[%s192_s28 + $0x18] sm:$0xff]   ;;  %v406_v26 = vunpack.c.l.bf16 %v405_v19  ;;  %v407_v27 = vunpack.c.h.bf16 %v405_v19  ;;  %v410_v30 = vunpack.c.l.bf16 %v440_v22  ;;  %v411_v31 = vunpack.c.h.bf16 %v440_v22  ;;  %v231_v32 = vld [vmem:[%s192_s28 + $0x20] sm:$0xf] }
  0x13   : > { %455 = vrsqrt.f32 %v215_v15  ;;  %v414_v33 = vunpack.c.l.bf16 %v441_v24  ;;  %v415_v34 = vunpack.c.h.bf16 %v441_v24  ;;  %v418_v35 = vunpack.c.l.bf16 %v442_v25 }
  0x14   : > { %v419_v36 = vunpack.c.h.bf16 %v442_v25  ;;  %v240_v40 = vunpack.c.l.bf16 %v231_v32 }
  0x1d   : > { %v456_v21 = vpop.eup %455 }
  0x1e   : > { %v217_v23 = vmul.f32 %v456_v21, %v214_v18 }
  0x20   : > { %v218_v28 = vmul.f32 %v217_v23, %v209_v10  ;;  %v244_v29 = vrot.slane %v217_v23, %v243_v20 }
  0x22   : > { %v220_v37 = vrot.slane %v218_v28, 7  ;;  %v245_v39 = vmul.f32 %v406_v26, %v244_v29  ;;  %v246_v42 = vmul.f32 %v407_v27, %v244_v29  ;;  %v247_v43 = vmul.f32 %v410_v30, %v244_v29 }
  0x23   : > { %v248_v44 = vmul.f32 %v411_v31, %v244_v29  ;;  %v249_v45 = vmul.f32 %v414_v33, %v244_v29  ;;  %v250_v46 = vmul.f32 %v415_v34, %v244_v29  ;;  %v251_v47 = vmul.f32 %v418_v35, %v244_v29 }
  0x24   : > { %v222_v41 = vsub.f32 %v214_v18, %v220_v37  ;;  %v252_v48 = vmul.f32 %v419_v36, %v244_v29  ;;  %v253_v50 = vmul.f32 %v244_v29, %v240_v40 }
  0x26   : > { %v257_v49 = vrot.slane %v222_v41, %v256_v38 }
  0x28   : > { %v258_v51 = vadd.f32 %v257_v49, %v245_v39  ;;  %v259_v52 = vadd.f32 %v257_v49, %v246_v42  ;;  %v260_v53 = vadd.f32 %v257_v49, %v247_v43  ;;  %v261_v54 = vadd.f32 %v257_v49, %v248_v44 }
  0x29   : > { %v262_v55 = vadd.f32 %v257_v49, %v249_v45  ;;  %v263_v56 = vadd.f32 %v257_v49, %v250_v46  ;;  %v264_v57 = vadd.f32 %v257_v49, %v251_v47  ;;  %v265_v58 = vadd.f32 %v257_v49, %v252_v48 }
  0x2a   : > { %v267_v59 = vmax.f32 %v258_v51, 0.0  ;;  %v268_v60 = vmax.f32 %v259_v52, 0.0  ;;  %v269_v61 = vmax.f32 %v260_v53, 0.0  ;;  %v270_v62 = vmax.f32 %v261_v54, 0.0 }
  0x2b   : > { %v271_v63 = vmax.f32 %v262_v55, 0.0  ;;  %v272_v0 = vmax.f32 %v263_v56, 0.0  ;;  %v273_v1 = vmax.f32 %v264_v57, 0.0  ;;  %v274_v2 = vmax.f32 %v265_v58, 0.0 }
  0x2c   : > { %v423_v3 = vpack.c.bf16 %v268_v60, %v267_v59  ;;  %v428_v4 = vpack.c.bf16 %v270_v62, %v269_v61  ;;  %v266_v5 = vadd.f32 %v257_v49, %v253_v50 }
  0x2d   : > { %v433_v6 = vpack.c.bf16 %v272_v0, %v271_v63  ;;  %v438_v7 = vpack.c.bf16 %v274_v2, %v273_v1 }
  0x2e   : > { %424 = vst [vmem:[%s197_s7] sm:$0xff] %v423_v3   ;;  %443 = vst [vmem:[%s197_s7 + $0x8] sm:$0xff] %v428_v4   ;;  %v275_v8 = vmax.f32 %v266_v5, 0.0 }
  0x2f   : > { %444 = vst [vmem:[%s197_s7 + $0x10] sm:$0xff] %v433_v6   ;;  %445 = vst [vmem:[%s197_s7 + $0x18] sm:$0xff] %v438_v7  }
  0x30   : > { %v403_v9 = vpack.c.bf16 %v275_v8, %v275_v8 }
  0x32   : > { %321 = vst [vmem:[%s197_s7 + $0x20] sm:$0xf] %v403_v9 }
  0x33 PF: > { %s14_s15 = sadd.s32 1, %s463_s15  }
  0x34   : > { %p11_p4 = scmp.ge.s32.totalorder %s14_s15, 4  }
  0x36   :  { %13 = sbr.rel (!%p11_p4) target bundleno = 1 (0x1), region = 66 }

// kernel: rir_block_apply.4
= control target key start
LH: loop header
LB: loop body
LE: loop exit
PB: predicated region body
PF: predicated region fallthrough
CT: control target
= control target key end

     0   :  { %s2742_s18 = smov 0   ;;  %s3118_s0 = inlined_call_operand.vmem [shape: bf16[2,4,90,8], index: 0, kind: input, shape index: {}]   ;;  %s3119_s1 = inlined_call_operand.vmem [shape: bf16[72,128], index: 1, kind: input, shape index: {}]   ;;  %s3120_s2 = inlined_call_operand.vmem [shape: f32[72,1], index: 2, kind: input, shape index: {}]   ;;  %s3121_s3 = inlined_call_operand.vmem [shape: bf16[2,72,128], index: 3, kind: output, shape index: {0}]   ;;  %s3122_s4 = inlined_call_operand.vmem [shape: f32[2,1,128], index: 4, kind: output, shape index: {1}]   ;;  %s3123_s5 = inlined_call_operand.vmem [shape: f32[2,1,128], index: 5, kind: output, shape index: {2}]  }
   0x1 LB: > { %s2051_s19 = sadd.s32 4294967295, %s2707_s18   ;;  %p2055_p0 = scmp.ge.s32.totalorder %s2707_s18, 1  ;;  %s2707_s18 = sphi %s2742_s18, %s16_s18  }
   0x2   : > { %p192_p1 = scmp.lt.s32.totalorder %s2707_s18, 3 }
   0x4   : > { %p193_p2 = pnand %p2055_p0, %p192_p1 }
   0x5   : > { %vm310_vm0 = vcmask (!%p193_p2), 1043456   ;;  %v909_v0 = vld [vmem:[%s3119_s1 + $0x10] sm:$0xf] (!%p193_p2)  ;;  %v261_v1 = vld [vmem:[%s3119_s1] sm:$0xf] (!%p193_p2)  ;;  %v2709_v2 = vmov (!%p193_p2), 0.0  }
   0x6   : > { %196 = sbr.rel (%p193_p2) target bundleno = 427 (0x1ab), region = 32  ;;  %2380 = vmatprep.subr.bf16.mxu0 (!%p193_p2), %v2709_v2  ;;  %2292 = vmatprep.subr.bf16.mxu1 (!%p193_p2), %v2709_v2  ;;  %v2759_v3 = vsel (!%p193_p2), %vm310_vm0, %v909_v0, 0  ;;  %v312_v4 = vsel (!%p193_p2), %vm310_vm0, %v261_v1, 0  ;;  %p226_p3 = scmp.lt.s32.totalorder (!%p193_p2), %s2051_s19, 1  ;;  %vm2710_vm1 = vmmov (!%p193_p2), 0   ;;  %vm294_vm2 = vcmask (!%p193_p2), 64512  }
   0x7   : > { %2381 = vmatpush3.bf16.msra.mxu0 (!%p193_p2), %v2759_v3  ;;  %2293 = vmatpush3.bf16.msra.mxu1 (!%p193_p2), %v312_v4  ;;  %v1060_v5 = vld [vmem:[%s3119_s1 + $0x14] sm:$0xf] (!%p193_p2)  ;;  %v414_v6 = vld [vmem:[%s3119_s1 + $0x4] sm:$0xf] (!%p193_p2)  ;;  %vm600_vm3 = vsmask.f32 (!%p193_p2), 7424 }
   0x8   : > { %2294 = vmatprep.mubr.msk.bf16.mxu1 (!%p193_p2), %vm2710_vm1, %v2709_v2  ;;  %2382 = vmatprep.mubr.msk.bf16.mxu0 (!%p193_p2), %vm2710_vm1, %v2709_v2  ;;  %v1150_v9 = vsel (!%p193_p2), %vm310_vm0, %v1060_v5, 0  ;;  %v463_v10 = vsel (!%p193_p2), %vm310_vm0, %v414_v6, 0  ;;  %v1252_v24 = vld [vmem:[%s3119_s1 + $0x18] sm:$0xf] (!%p193_p2)  ;;  %vm1671_vm4 = vcmask (!%p193_p2), 1046528  }
   0x9   : > { %2402 = vmatprep.subr.bf16.mxu0 (!%p193_p2), %v2709_v2  ;;  %2314 = vmatprep.subr.bf16.mxu1 (!%p193_p2), %v2709_v2  ;;  %v1342_v30 = vsel (!%p193_p2), %vm310_vm0, %v1252_v24, 0 }
   0xd   : > { %s3125_s19 = smov (!%p226_p3, %s2051_s19), 1 }
   0xe   : > { %s2641_s24 = smul.u32 192, %s3125_s19  ;;  %s238_s20 = scalar_lea.vmem %s3122_s4, %s3125_s19 }
   0xf   : > { %s241_s23 = scalar_lea.vmem %s3123_s5, %s3125_s19 }
  0x10   : > { %s2778_s29 = scalar_lea.vmem %s3118_s0, %s2641_s24 }
  0x11   : > { %v2656_v7 = vld [vmem:[%s2778_s29] sm:$0xff]   ;;  %v2657_v8 = vld [vmem:[%s2778_s29 + $0x90] sm:$0xff]   ;;  %v2658_v11 = vld [vmem:[%s2778_s29 + $0x8] sm:$0xff]  }
  0x12   : > { %2295 = vmatmul.mubr.msk.bf16.vlgmr.msra.gmra.mrb[0].mxu1 %vm294_vm2, %v2656_v7  ;;  %2383 = vmatmul.mubr.msk.bf16.vlgmr.msra.gmra.mrb[0].mxu0 %vm294_vm2, %v2657_v8  ;;  %v2659_v12 = vld [vmem:[%s2778_s29 + $0x98] sm:$0xff]   ;;  %v2663_v13 = vld [vmem:[%s2778_s29 + $0x60] sm:$0xff]   ;;  %v2664_v14 = vld [vmem:[%s2778_s29 + $0x68] sm:$0xff]  }
  0x13   : > { %2298 = vmatprep.mubr.msk.bf16.mxu1 %vm2710_vm1, %v2709_v2  ;;  %2403 = vmatpush3.bf16.msra.mxu0 %v1150_v9  ;;  %v1098_v15 = vshll.u32 %v2663_v13, 16  ;;  %v2660_v16 = vld [vmem:[%s2778_s29 + $0x10] sm:$0xff]   ;;  %v2661_v17 = vld [vmem:[%s2778_s29 + $0xa0] sm:$0xff]   ;;  %v1096_v18 = vshrl.u32 %v2663_v13, 16  ;;  %v1103_v20 = vshll.u32 %v2664_v14, 16  ;;  %v2662_v25 = vld [vmem:[%s2778_s29 + $0x18] sm:$0xff]  }
  0x14   : > { %2386 = vmatprep.mubr.msk.bf16.mxu0 %vm2710_vm1, %v2709_v2  ;;  %2315 = vmatpush3.bf16.msra.mxu1 %v463_v10  ;;  %v2666_v21 = vld [vmem:[%s2778_s29 + $0x70] sm:$0xff]   ;;  %v1107_v28 = vshrl.u32 %v2664_v14, 16  ;;  %v2820_v29 = vld [vmem:[%s2778_s29 + $0x78] sm:$0xff]   ;;  %v2665_v36 = vld [vmem:[%s2778_s29 + $0x20] ss:$0 sps:$4 sm:$0xff]  }
  0x15   : > { %2424 = vmatprep.subr.bf16.mxu0 %v2709_v2  ;;  %2336 = vmatprep.subr.bf16.mxu1 %v2709_v2  ;;  %v1100_v19 = vrot.slane %v1098_v15, 1  ;;  %v1105_v23 = vrot.slane %v1103_v20, 1  ;;  %v1111_v26 = vshll.u32 %v2666_v21, 16  ;;  %v2679_v31 = vld [vmem:[%s2778_s29 + $0x1c] sm:$0xff]   ;;  %v2680_v32 = vld [vmem:[%s2778_s29 + $0x10] sm:$0xff]   ;;  %v1115_v33 = vshrl.u32 %v2666_v21, 16 }
  0x16   : > { %v1311_v35 = vshll.u32 %v2679_v31, 16  ;;  %v1119_v38 = vshll.u32 %v2820_v29, 16  ;;  %v617_v39 = vshll.u32 %v2680_v32, 16  ;;  %v2834_v40 = vld [vmem:[%s2778_s29 + $0x24] sm:$0x1f]   ;;  %v1315_v42 = vshrl.u32 %v2679_v31, 16 }
  0x17   : > { %v1101_v22 = vor.u32 %v1100_v19, %v1096_v18  ;;  %v1113_v34 = vrot.slane %v1111_v26, 1  ;;  %v1109_v37 = vor.u32 %v1107_v28, %v1105_v23  ;;  %v2682_v43 = vld [vmem:[%s2778_s29 + $0x18] sm:$0xff]   ;;  %v621_v44 = vshrl.u32 %v2680_v32, 16  ;;  %v2844_v47 = vld [vmem:[%s2778_s29 + $0x80] sm:$0x1f]   ;;  %v2667_v6 = vld [vmem:[%s2778_s29 + $0x30] sm:$0xff]  }
  0x18   : > { %v2837_v41 = vrot.slane %v1311_v35, 1  ;;  %v2840_v45 = vrot.slane %v617_v39, 1  ;;  %v1319_v46 = vshll.u32 %v2834_v40, 16  ;;  %v1123_v48 = vshrl.u32 %v2820_v29, 16  ;;  %v2849_v51 = vld [vmem:[%s2778_s29 + $0x20] sm:$0x1f]  }
  0x19   : > { %v1106_v27 = vsel %vm600_vm3, %v1101_v22, %v1105_v23  ;;  %v625_v50 = vshll.u32 %v2682_v43, 16  ;;  %v1114_v52 = vsel %vm600_vm3, %v1109_v37, %v1113_v34  ;;  %v629_v55 = vshrl.u32 %v2682_v43, 16  ;;  %v2684_v58 = vld [vmem:[%s2778_s29 + $0x34] sm:$0xff]   ;;  %v2685_v59 = vld [vmem:[%s2778_s29 + $0x3c] sm:$0xff]   ;;  %v2686_v63 = vld [vmem:[%s2778_s29 + $0x44] sm:$0xff]  }
  0x1a   : > { %2299 = vmatmul.mubr.msk.bf16.gmra.mrb[4].mxu1 %vm294_vm2, %v2658_v11  ;;  %2387 = vmatmul.mubr.msk.bf16.gmra.mrb[4].mxu0 %vm294_vm2, %v2659_v12  ;;  %v1317_v49 = vor.u32 %v1315_v42, %v2837_v41  ;;  %v2852_v53 = vrot.slane %v1319_v46, 1  ;;  %v623_v54 = vor.u32 %v621_v44, %v2840_v45  ;;  %v633_v57 = vshll.u32 %v2849_v51, 16  ;;  %v565_v7 = vld [vmem:[%s3119_s1 + $0x8] sm:$0xf]  ;;  %v2688_v12 = vld [vmem:[%s2778_s29 + $0x4c] sm:$0xff]   ;;  %v1798_v43 = vld [vmem:[%s3120_s2] sm:$0xff] }
  0x1b   : > { %2302 = vmatprep.mubr.msk.bf16.mxu1 %vm2710_vm1, %v2709_v2  ;;  %2390 = vmatprep.mubr.msk.bf16.mxu0 %vm2710_vm1, %v2709_v2  ;;  %v627_v56 = vrot.slane %v625_v50, 1  ;;  %v1117_v60 = vor.u32 %v1115_v33, %v1113_v34  ;;  %v1121_v61 = vrot.slane %v1119_v38, 1  ;;  %v1480_v5 = vshrl.u32 %v2684_v58, 16  ;;  %v2673_v39 = vld [vmem:[%s2778_s29 + $0x4] sm:$0xff]   ;;  %v1800_v44 = vld [vmem:[%s3120_s2 + $0x10] sm:$0xff] }
  0x1c   : > { %v2861_v62 = vsel %vm600_vm3, %v1317_v49, %v2852_v53  ;;  %v2870_v4 = vrot.slane %v633_v57, 1  ;;  %v1482_v8 = vshll.u32 %v2684_v58, 16  ;;  %v1487_v9 = vshll.u32 %v2685_v59, 16  ;;  %v2674_v46 = vld [vmem:[%s2778_s29 + $0xc] sm:$0xff]   ;;  %v2671_v50 = vld [vmem:[%s2778_s29 + $0x40] sm:$0xff]  }
  0x1d   : > { %v2868_v0 = vsel %vm600_vm3, %v623_v54, %v627_v56  ;;  %v631_v1 = vor.u32 %v629_v55, %v627_v56  ;;  %v1491_v10 = vshrl.u32 %v2685_v59, 16  ;;  %v1495_v11 = vshll.u32 %v2686_v63, 16  ;;  %v1801_v54 = vld [vmem:[%s3120_s2 + $0x18] sm:$0xff]  ;;  %v1802_v58 = vld [vmem:[%s3120_s2 + $0x20] sm:$0xff]  ;;  %v1803_v59 = vld [vmem:[%s3120_s2 + $0x28] sm:$0xff] }
  0x1e   : > { %v1127_v13 = vshll.u32 %v2844_v47, 16  ;;  %v1499_v15 = vshrl.u32 %v2686_v63, 16  ;;  %v1503_v19 = vshll.u32 %v2688_v12, 16  ;;  %v1122_v20 = vsel %vm600_vm3, %v1117_v60, %v1121_v61  ;;  %v2676_v63 = vld [vmem:[%s2778_s29 + $0x14] sm:$0xff]  }
  0x1f   : > { %v2882_v14 = vsel %vm600_vm3, %v631_v1, %v2870_v4  ;;  %v1497_v18 = vrot.slane %v1495_v11, 1  ;;  %v656_v26 = vsel %vm310_vm0, %v565_v7, 0  ;;  %v1125_v33 = vor.u32 %v1123_v48, %v1121_v61  ;;  %v2672_v1 = vld [vmem:[%s2778_s29 + $0x48] sm:$0xff]   ;;  %v2677_v7 = vld [vmem:[%s2778_s29] sm:$0xff]  }
  0x20   : > { %v1505_v24 = vrot.slane %v1503_v19, 1  ;;  %v1129_v34 = vrot.slane %v1127_v13, 1  ;;  %v1131_v42 = vshrl.u32 %v2844_v47, 16  ;;  %v1290_v48 = vshll.u32 %v2673_v39, 16  ;;  %v1799_v47 = vld [vmem:[%s3120_s2 + $0x8] sm:$0xff]  ;;  %v1806_v13 = vld [vmem:[%s3120_s2 + $0x40] sm:$0xff] }
  0x21   : > { %v1501_v23 = vor.u32 %v1499_v15, %v1497_v18  ;;  %v2711_v49 = vmov 0   ;;  %v1288_v55 = vshrl.u32 %v2673_v39, 16  ;;  %v1295_v57 = vshll.u32 %v2674_v46, 16  ;;  %v2678_v15 = vld [vmem:[%s2778_s29 + $0x8] sm:$0xff]   ;;  %v2675_v19 = vld [vmem:[%s2778_s29 + $0x50] ss:$0 sps:$4 sm:$0xff]  }
  0x22   : > { %2303 = vmatmul.mubr.msk.bf16.gmra.mrb[8].mxu1 %vm294_vm2, %v2660_v16  ;;  %2391 = vmatmul.mubr.msk.bf16.gmra.mrb[8].mxu0 %vm294_vm2, %v2661_v17  ;;  %v1484_v16 = vrot.slane %v1482_v8, 1  ;;  %v1489_v17 = vrot.slane %v1487_v9, 1  ;;  %v1130_v38 = vsel %vm600_vm3, %v1125_v33, %v1129_v34  ;;  %v1292_v56 = vrot.slane %v1290_v48, 1  ;;  %v1805_v8 = vld [vmem:[%s3120_s2 + $0x38] sm:$0xff]  ;;  %v2695_v48 = vld [vmem:[%s2778_s29 + $0x80] ss:$0 sps:$4 sm:$0xff]  }
  0x23   : > { %2306 = vmatprep.mubr.msk.bf16.mxu1 %vm2710_vm1, %v2709_v2  ;;  %2404 = vmatprep.mubr.msk.bf16.mxu0 %vm2710_vm1, %v2709_v2  ;;  %v1297_v61 = vrot.slane %v1295_v57, 1  ;;  %v1303_v11 = vshll.u32 %v2676_v63, 16  ;;  %v2699_v57 = vld [vmem:[%s2778_s29 + $0xb0] ss:$0 sps:$4 sm:$0xff]  }
  0x24   : > { %v1485_v21 = vor.u32 %v1484_v16, %v1480_v5  ;;  %v1493_v22 = vor.u32 %v1491_v10, %v1489_v17  ;;  %2654 = vset.pattern.permute.xlu0 %v2711_v49  ;;  %2655 = vset.pattern.permute.xlu1 %v2711_v49  ;;  %v1293_v60 = vor.u32 %v1292_v56, %v1288_v55  ;;  %v1444_v5 = vld [vmem:[%s3119_s1 + $0x1c] sm:$0xf]  ;;  %v1299_v10 = vshrl.u32 %v2674_v46, 16  ;;  %v2700_v55 = vld [vmem:[%s2778_s29 + $0x24] sm:$0x1f]  }
  0x25   : > { %1809 = vperm.xlu0 %2654, %v1798_v43   ;;  %1819 = vperm.xlu1 %2655, %v1800_v44   ;;  %v604_v16 = vshll.u32 %v2677_v7, 16  ;;  %v2696_v44 = vld [vmem:[%s2778_s29 + $0x14] sm:$0xff]   ;;  %v1679_v56 = vrot.slane %v2700_v55, 1 }
  0x26   : > { %v2891_v28 = vsel %vm600_vm3, %v1485_v21, %v1489_v17  ;;  %v2894_v29 = vsel %vm600_vm3, %v1493_v22, %v1497_v18  ;;  %v1298_v9 = vsel %vm600_vm3, %v1293_v60, %v1297_v61  ;;  %v1301_v17 = vor.u32 %v1299_v10, %v1297_v61 }
  0x27   : > { %v1305_v18 = vrot.slane %v1303_v11, 1  ;;  %v606_v21 = vrot.slane %v604_v16, 1  ;;  %v609_v22 = vshll.u32 %v2678_v15, 16  ;;  %v1675_v46 = vrot.slane %v2696_v44, 1 }
  0x29   : > { %1814 = vperm.xlu0 %2654, %v1799_v47   ;;  %1824 = vperm.xlu1 %2655, %v1801_v54  }
  0x2a   : > { %2307 = vmatmul.mubr.msk.bf16.gmra.mrb[12].mxu1 %vm294_vm2, %v2662_v25  ;;  %2405 = vmatmul.mubr.msk.bf16.vlgmr.msra.gmra.mrb[0].mxu0 %vm294_vm2, %v1106_v27  ;;  %v2886_v25 = vld [vmem:[%s2778_s29 + $0x54] sm:$0x1f]   ;;  %v1507_v27 = vshrl.u32 %v2688_v12, 16  ;;  %v1534_v12 = vsel %vm310_vm0, %v1444_v5, 0 }
  0x2b   : > { %2310 = vmatprep.mubr.msk.bf16.mxu1 %vm2710_vm1, %v2709_v2  ;;  %2425 = vmatpush3.bf16.msra.mxu0 %v1342_v30  ;;  %v2897_v30 = vsel %vm600_vm3, %v1501_v23, %v1505_v24  ;;  %v1511_v31 = vshll.u32 %v2886_v25, 16  ;;  %v1306_v23 = vsel %vm600_vm3, %v1301_v17, %v1305_v18 }
  0x2c   : > { %2408 = vmatprep.mubr.msk.bf16.mxu0 %vm2710_vm1, %v2709_v2  ;;  %2446 = vmatprep.subr.bf16.mxu0 %v2709_v2  ;;  %v1509_v32 = vor.u32 %v1507_v27, %v1505_v24  ;;  %v1307_v24 = vshrl.u32 %v2676_v63, 16  ;;  %v611_v27 = vrot.slane %v609_v22, 1 }
  0x2d   : > { %v2905_v35 = vrot.slane %v1511_v31, 1  ;;  %1829 = vperm.xlu0 %2654, %v1802_v58   ;;  %1834 = vperm.xlu1 %2655, %v1803_v59  }
  0x2e   : > { %v1309_v31 = vor.u32 %v1307_v24, %v1305_v18 }
  0x2f   : > { %v2911_v37 = vsel %vm600_vm3, %v1509_v32, %v2905_v35  ;;  %v758_v32 = vld [vmem:[%s3119_s1 + $0xc] sm:$0xf] }
  0x31   : > { %1844 = vperm.xlu1 %2655, %v1805_v8  }
  0x32   : > { %2311 = vmatmul.mubr.msk.bf16.gmra.mrb[16].mxu1 %vm294_vm2, %v2665_v36  ;;  %2409 = vmatmul.mubr.msk.bf16.gmra.mrb[4].mxu0 %vm294_vm2, %v1114_v52  ;;  %v2669_v36 = vld [vmem:[%s2778_s29 + $0x38] sm:$0xff]   ;;  %v1133_v52 = vor.u32 %v1131_v42, %v1129_v34  ;;  %v613_v34 = vshrl.u32 %v2678_v15, 16 }
  0x33   : > { %2316 = vmatprep.mubr.msk.bf16.mxu1 %vm2710_vm1, %v2709_v2  ;;  %2412 = vmatprep.mubr.msk.bf16.mxu0 %vm2710_vm1, %v2709_v2 }
  0x34   : > { %v615_v39 = vor.u32 %v613_v34, %v611_v27 }
  0x36   : > { %v620_v42 = vsel %vm600_vm3, %v615_v39, %v2840_v45 }
  0x3a   : > { %2317 = vmatmul.mubr.msk.bf16.vlgmr.msra.gmra.mrb[0].mxu1 %vm294_vm2, %v2667_v6  ;;  %2413 = vmatmul.mubr.msk.bf16.gmra.mrb[8].mxu0 %vm294_vm2, %v1122_v20  ;;  %v1804_v6 = vld [vmem:[%s3120_s2 + $0x30] sm:$0xff]  ;;  %v602_v20 = vshrl.u32 %v2677_v7, 16 }
  0x3b   : > { %2320 = vmatprep.mubr.msk.bf16.mxu1 %vm2710_vm1, %v2709_v2  ;;  %2416 = vmatprep.mubr.msk.bf16.mxu0 %vm2710_vm1, %v2709_v2 }
  0x3c   : > { %2337 = vmatpush3.bf16.msra.mxu1 %v656_v26  ;;  %1839 = vperm.xlu0 %2654, %v1804_v6   ;;  %v607_v26 = vor.u32 %v606_v21, %v602_v20 }
  0x3d   : > { %2358 = vmatprep.subr.bf16.mxu1 %v2709_v2 }
  0x3e   : > { %v612_v33 = vsel %vm600_vm3, %v607_v26, %v611_v27 }
  0x40   : > { %1849 = vperm.xlu0 %2654, %v1806_v13  }
  0x42   : > { %2321 = vmatmul.mubr.msk.bf16.gmra.mrb[4].mxu1 %vm294_vm2, %v2669_v36  ;;  %2417 = vmatmul.mubr.msk.bf16.gmra.mrb[12].mxu0 %vm294_vm2, %v1130_v38  ;;  %v1314_v36 = vsel %vm600_vm3, %v1309_v31, %v2837_v41  ;;  %v807_v38 = vsel %vm310_vm0, %v758_v32, 0  ;;  %v1323_v41 = vshrl.u32 %v2834_v40, 16  ;;  %v1636_v40 = vld [vmem:[%s3119_s1 + $0x20] sm:$0xf] }
  0x43   : > { %2324 = vmatprep.mubr.msk.bf16.mxu1 %vm2710_vm1, %v2709_v2  ;;  %2420 = vmatprep.mubr.msk.bf16.mxu0 %vm2710_vm1, %v2709_v2  ;;  %v1697_v45 = vsel %vm310_vm0, %v1636_v40, 0 }
  0x44   : > { %v1325_v43 = vor.u32 %v1323_v41, %v2852_v53  ;;  %v637_v53 = vshrl.u32 %v2849_v51, 16  ;;  %v2687_v51 = vld [vmem:[%s2778_s29 + $0x60] sm:$0xff]  }
  0x4a   : > { %2325 = vmatmul.mubr.msk.bf16.gmra.mrb[8].mxu1 %vm294_vm2, %v2671_v50  ;;  %2421 = vmatmul.mubr.msk.bf16.gmra.mrb[16].mxu0 %vm294_vm2, %v1133_v52  ;;  %v2698_v50 = vld [vmem:[%s2778_s29 + $0x1c] sm:$0xff]   ;;  %v2697_v52 = vld [vmem:[%s2778_s29 + $0xa8] sm:$0xff]  }
  0x4b   : > { %2328 = vmatprep.mubr.msk.bf16.mxu1 %vm2710_vm1, %v2709_v2  ;;  %2426 = vmatprep.mubr.msk.bf16.mxu0 %vm2710_vm1, %v2709_v2  ;;  %v1677_v47 = vrot.slane %v2698_v50, 1 }
  0x4d   : > { %v1678_v54 = vsel %vm1671_vm4, %v1675_v46, %v1677_v47  ;;  %v1680_v58 = vsel %vm1671_vm4, %v1677_v47, %v1679_v56 }
  0x52   : > { %2329 = vmatmul.mubr.msk.bf16.gmra.mrb[12].mxu1 %vm294_vm2, %v2672_v1  ;;  %2427 = vmatmul.mubr.msk.bf16.vlgmr.msra.gmra.mrb[0].mxu0 %vm294_vm2, %v1298_v9 }
  0x53   : > { %2332 = vmatprep.mubr.msk.bf16.mxu1 %vm2710_vm1, %v2709_v2  ;;  %2447 = vmatpush3.bf16.msra.mxu0 %v1534_v12 }
  0x54   : > { %2430 = vmatprep.mubr.msk.bf16.mxu0 %vm2710_vm1, %v2709_v2  ;;  %2468 = vmatprep.subr.bf16.mxu0 %v2709_v2 }
  0x5a   : > { %2333 = vmatmul.mubr.msk.bf16.gmra.mrb[16].mxu1 %vm294_vm2, %v2675_v19  ;;  %2431 = vmatmul.mubr.msk.bf16.gmra.mrb[4].mxu0 %vm294_vm2, %v1306_v23 }
  0x5b   : > { %2338 = vmatprep.mubr.msk.bf16.mxu1 %vm2710_vm1, %v2709_v2  ;;  %2434 = vmatprep.mubr.msk.bf16.mxu0 %vm2710_vm1, %v2709_v2 }
  0x62   : > { %2339 = vmatmul.mubr.msk.bf16.vlgmr.msra.gmra.mrb[0].mxu1 %vm294_vm2, %v612_v33  ;;  %2435 = vmatmul.mubr.msk.bf16.gmra.mrb[8].mxu0 %vm294_vm2, %v1314_v36 }
  0x63   : > { %2342 = vmatprep.mubr.msk.bf16.mxu1 %vm2710_vm1, %v2709_v2  ;;  %2438 = vmatprep.mubr.msk.bf16.mxu0 %vm2710_vm1, %v2709_v2 }
  0x64   : > { %2359 = vmatpush3.bf16.msra.mxu1 %v807_v38 }
  0x65   : > { %2490 = vmatprep.subr.bf16.mxu1 %v2709_v2 }
  0x6a   : > { %2343 = vmatmul.mubr.msk.bf16.gmra.mrb[4].mxu1 %vm294_vm2, %v620_v42  ;;  %2439 = vmatmul.mubr.msk.bf16.gmra.mrb[12].mxu0 %vm294_vm2, %v2861_v62  ;;  %v639_v62 = vor.u32 %v637_v53, %v2870_v4  ;;  %v1515_v4 = vshrl.u32 %v2886_v25, 16 }
  0x6b   : > { %2346 = vmatprep.mubr.msk.bf16.mxu1 %vm2710_vm1, %v2709_v2  ;;  %2442 = vmatprep.mubr.msk.bf16.mxu0 %vm2710_vm1, %v2709_v2 }
  0x72   : > { %2347 = vmatmul.mubr.msk.bf16.gmra.mrb[8].mxu1 %vm294_vm2, %v2868_v0  ;;  %2443 = vmatmul.mubr.msk.bf16.gmra.mrb[16].mxu0 %vm294_vm2, %v1325_v43  ;;  %v2689_v0 = vld [vmem:[%s2778_s29 + $0x68] sm:$0xff]  }
  0x73   : > { %2350 = vmatprep.mubr.msk.bf16.mxu1 %vm2710_vm1, %v2709_v2  ;;  %2448 = vmatprep.mubr.msk.bf16.mxu0 %vm2710_vm1, %v2709_v2 }
  0x7a   : > { %2351 = vmatmul.mubr.msk.bf16.gmra.mrb[12].mxu1 %vm294_vm2, %v2882_v14  ;;  %2449 = vmatmul.mubr.msk.bf16.vlgmr.msra.gmra.mrb[0].mxu0 %vm294_vm2, %v2891_v28  ;;  %v2691_v14 = vld [vmem:[%s2778_s29 + $0x70] sm:$0xff]   ;;  %v1517_v28 = vor.u32 %v1515_v4, %v2905_v35 }
  0x7b   : > { %2354 = vmatprep.mubr.msk.bf16.mxu1 %vm2710_vm1, %v2709_v2  ;;  %2469 = vmatpush3.bf16.msra.mxu0 %v1697_v45 }
  0x7c   : > { %2452 = vmatprep.mubr.msk.bf16.mxu0 %vm2710_vm1, %v2709_v2 }
  0x82   : > { %2355 = vmatmul.mubr.msk.bf16.gmra.mrb[16].mxu1 %vm294_vm2, %v639_v62  ;;  %2453 = vmatmul.mubr.msk.bf16.gmra.mrb[4].mxu0 %vm294_vm2, %v2894_v29  ;;  %v2694_v29 = vld [vmem:[%s2778_s29 + $0xc] sm:$0xff]  }
  0x83   : > { %2360 = vmatprep.mubr.msk.bf16.mxu1 %vm2710_vm1, %v2709_v2  ;;  %2456 = vmatprep.mubr.msk.bf16.mxu0 %vm2710_vm1, %v2709_v2 }
  0x8a   : > { %2361 = vmatmul.mubr.msk.bf16.vlgmr.msra.gmra.mrb[0].mxu1 %vm294_vm2, %v2687_v51  ;;  %2457 = vmatmul.mubr.msk.bf16.gmra.mrb[8].mxu0 %vm294_vm2, %v2897_v30  ;;  %v1673_v30 = vrot.slane %v2694_v29, 1 }
  0x8b   : > { %2364 = vmatprep.mubr.msk.bf16.mxu1 %vm2710_vm1, %v2709_v2  ;;  %2460 = vmatprep.mubr.msk.bf16.mxu0 %vm2710_vm1, %v2709_v2 }
  0x8c   : > { %2491 = vmatpush3.bf16.msra.mxu1 %v2759_v3  ;;  %v2693_v3 = vld [vmem:[%s2778_s29 + $0x4] sm:$0xfe]   ;;  %v1676_v49 = vsel %vm1671_vm4, %v1673_v30, %v1675_v46 }
  0x8d   : > { %v1672_v25 = vrot.slane %v2693_v3, 1 }
  0x8f   : > { %v1674_v35 = vsel %vm1671_vm4, %v1672_v25, %v1673_v30 }
  0x92   : > { %2365 = vmatmul.mubr.msk.bf16.gmra.mrb[4].mxu1 %vm294_vm2, %v2689_v0  ;;  %2461 = vmatmul.mubr.msk.bf16.gmra.mrb[12].mxu0 %vm294_vm2, %v2911_v37  ;;  %v2692_v37 = vld [vmem:[%s2778_s29 + $0x78] sm:$0xff]   ;;  %s2642_s29 = smul.u32 36, %s3125_s19 }
  0x93   : > { %2368 = vmatprep.mubr.msk.bf16.mxu1 %vm2710_vm1, %v2709_v2  ;;  %2464 = vmatprep.mubr.msk.bf16.mxu0 %vm2710_vm1, %v2709_v2 }
  0x94   : > { %s3100_s15 = scalar_lea.vmem %s3121_s3, %s2642_s29 }
  0x9a   : > { %2369 = vmatmul.mubr.msk.bf16.gmra.mrb[8].mxu1 %vm294_vm2, %v2691_v14  ;;  %2465 = vmatmul.mubr.msk.bf16.gmra.mrb[16].mxu0 %vm294_vm2, %v1517_v28 }
  0x9b   : > { %2372 = vmatprep.mubr.msk.bf16.mxu1 %vm2710_vm1, %v2709_v2  ;;  %2470 = vmatprep.mubr.msk.bf16.mxu0 %vm2710_vm1, %v2709_v2 }
  0xa2   : > { %2373 = vmatmul.mubr.msk.bf16.gmra.mrb[12].mxu1 %vm294_vm2, %v2692_v37  ;;  %2471 = vmatmul.mubr.msk.bf16.vlgmr.msra.gmra.mrb[0].mxu0 %vm294_vm2, %v1674_v35 }
  0xa3   : > { %2376 = vmatprep.mubr.msk.bf16.mxu1 %vm2710_vm1, %v2709_v2  ;;  %2474 = vmatprep.mubr.msk.bf16.mxu0 %vm2710_vm1, %v2709_v2 }
  0xa4   : > { %v1810_v12 = vpop.permute.xlu0 %1809  ;;  %v1820_v21 = vpop.permute.xlu1 %1819 }
  0xa8   : > { %v1815_v17 = vpop.permute.xlu0 %1814  ;;  %v1825_v38 = vpop.permute.xlu1 %1824 }
  0xaa   : > { %2377 = vmatmul.mubr.msk.bf16.gmra.mrb[16].mxu1 %vm294_vm2, %v2695_v48  ;;  %2475 = vmatmul.mubr.msk.bf16.gmra.mrb[4].mxu0 %vm294_vm2, %v1676_v49 }
  0xab   : > { %2394 = vmatprep.mubr.msk.bf16.mxu1 %vm2710_vm1, %v2709_v2  ;;  %2478 = vmatprep.mubr.msk.bf16.mxu0 %vm2710_vm1, %v2709_v2 }
  0xac   : > { %v1830_v53 = vpop.permute.xlu0 %1829  ;;  %v1835_v50 = vpop.permute.xlu1 %1834 }
  0xb2   : > { %2395 = vmatmul.mubr.msk.bf16.vlgmr.msra.gmra.mrb[12].mxu1 %vm294_vm2, %v2697_v52  ;;  %2479 = vmatmul.mubr.msk.bf16.gmra.mrb[8].mxu0 %vm294_vm2, %v1678_v54 }
  0xb3   : > { %2398 = vmatprep.mubr.msk.bf16.mxu1 %vm2710_vm1, %v2709_v2  ;;  %2482 = vmatprep.mubr.msk.bf16.mxu0 %vm2710_vm1, %v2709_v2 }
  0xba   : > { %2399 = vmatmul.mubr.msk.bf16.gmra.mrb[16].mxu1 %vm294_vm2, %v2699_v57  ;;  %2483 = vmatmul.mubr.msk.bf16.gmra.mrb[12].mxu0 %vm294_vm2, %v1680_v58 }
  0xbb   : > { %2486 = vmatprep.mubr.msk.bf16.mxu0 %vm2710_vm1, %v2709_v2  ;;  %v1840_v55 = vpop.permute.xlu0 %1839 }
  0xc2   : > { %2487 = vmatmul.mubr.msk.bf16.gmra.mrb[16].mxu0 %vm294_vm2, %v1679_v56 }
 0x15d   : > { %v843_v59 = vpop.f32.mrb[0].mxu1 }
 0x15e   : > { %v2362_v60 = vpop.f32.mrb[1].mxu1 }
 0x15f   : > { %v846_v61 = vpop.f32.mrb[2].mxu1 }
 0x160   : > { %v2363_v63 = vpop.f32.mrb[3].mxu1 }
 0x165   : > { %v851_v1 = vpop.f32.mrb[4].mxu1 }
 0x166   : > { %v2366_v5 = vpop.f32.mrb[5].mxu1 }
 0x167   : > { %v854_v6 = vpop.f32.mrb[6].mxu1 }
 0x168   : > { %v2367_v7 = vpop.f32.mrb[7].mxu1 }
 0x16d   : > { %v859_v8 = vpop.f32.mrb[8].mxu1 }
 0x16e   : > { %v2370_v9 = vpop.f32.mrb[9].mxu1 }
 0x16f   : > { %v862_v10 = vpop.f32.mrb[10].mxu1 }
 0x170   : > { %v2371_v11 = vpop.f32.mrb[11].mxu1 }
 0x175   : > { %v1733_v13 = vpop.f32.mrb[0].mxu0 }
 0x176   : > { %v2492_v15 = vadd.f32 %v1733_v13, %v843_v59  ;;  %v2472_v16 = vpop.f32.mrb[1].mxu0  ;;  %v1845_v13 = vpop.permute.xlu1 %1844 }
 0x177   : > { %v1736_v2 = vpop.f32.mrb[2].mxu0 }
 0x178   : > { %v1852_v18 = vmul.f32 %v2492_v15, %v1810_v12  ;;  %v2493_v19 = vadd.f32 %v1736_v2, %v846_v61  ;;  %v2473_v20 = vpop.f32.mrb[3].mxu0 }
 0x17a   : > { %v1853_v22 = vmul.f32 %v2493_v19, %v1815_v17  ;;  %v1922_v23 = vmul.f32 %v1852_v18, %v1852_v18 }
 0x17c   : > { %v2218_v24 = vpack.c.bf16 %v1853_v22, %v1852_v18  ;;  %v1907_v26 = vadd.f32 %v1853_v22, %v1852_v18  ;;  %v1923_v27 = vmul.f32 %v1853_v22, %v1853_v22 }
 0x17d   : > { %v1741_v31 = vpop.f32.mrb[4].mxu0 }
 0x17e   : > { %2219 = vst [vmem:[%s3100_s15] sm:$0xff] %v2218_v24   ;;  %v1931_v32 = vadd.f32 %v1923_v27, %v1922_v23  ;;  %v2494_v33 = vadd.f32 %v1741_v31, %v851_v1  ;;  %v2476_v34 = vpop.f32.mrb[5].mxu0 }
 0x17f   : > { %v1744_v36 = vpop.f32.mrb[6].mxu0 }
 0x180   : > { %v1854_v39 = vmul.f32 %v2494_v33, %v1820_v21  ;;  %v2495_v42 = vadd.f32 %v1744_v36, %v854_v6  ;;  %v2477_v41 = vpop.f32.mrb[7].mxu0 }
 0x182   : > { %v1924_v43 = vmul.f32 %v1854_v39, %v1854_v39  ;;  %v1855_v40 = vmul.f32 %v2495_v42, %v1825_v38  ;;  %v1908_v45 = vadd.f32 %v1907_v26, %v1854_v39  ;;  %v1850_v26 = vpop.permute.xlu0 %1849 }
 0x184   : > { %v2223_v62 = vpack.c.bf16 %v1855_v40, %v1854_v39  ;;  %v1909_v51 = vadd.f32 %v1908_v45, %v1855_v40  ;;  %v1925_v0 = vmul.f32 %v1855_v40, %v1855_v40  ;;  %v1932_v4 = vadd.f32 %v1931_v32, %v1924_v43 }
 0x185   : > { %v1018_v14 = vpop.f32.mrb[12].mxu1  ;;  %v1749_v28 = vpop.f32.mrb[8].mxu0 }
 0x186   : > { %v2396_v3 = vpop.f32.mrb[13].mxu1  ;;  %2235 = vst [vmem:[%s3100_s15 + $0x8] sm:$0xff] %v2223_v62   ;;  %v1933_v29 = vadd.f32 %v1932_v4, %v1925_v0  ;;  %v2496_v25 = vadd.f32 %v1749_v28, %v859_v8  ;;  %v2480_v30 = vpop.f32.mrb[9].mxu0 }
 0x187   : > { %v1021_v37 = vpop.f32.mrb[14].mxu1  ;;  %v1752_v35 = vpop.f32.mrb[10].mxu0 }
 0x188   : > { %v2397_v44 = vpop.f32.mrb[15].mxu1  ;;  %v1856_v46 = vmul.f32 %v2496_v25, %v1830_v53  ;;  %v2497_v48 = vadd.f32 %v1752_v35, %v862_v10  ;;  %v2481_v49 = vpop.f32.mrb[11].mxu0 }
 0x18a   : > { %v1910_v47 = vadd.f32 %v1909_v51, %v1856_v46  ;;  %v1926_v52 = vmul.f32 %v1856_v46, %v1856_v46  ;;  %v1857_v54 = vmul.f32 %v2497_v48, %v1835_v50 }
 0x18c   : > { %v1934_v56 = vadd.f32 %v1933_v29, %v1926_v52  ;;  %v2228_v57 = vpack.c.bf16 %v1857_v54, %v1856_v46  ;;  %v1911_v58 = vadd.f32 %v1910_v47, %v1857_v54  ;;  %v1927_v59 = vmul.f32 %v1857_v54, %v1857_v54 }
 0x18d   : > { %v1026_v60 = vpop.f32.mrb[16].mxu1  ;;  %v1757_v61 = vpop.f32.mrb[12].mxu0 }
 0x18e   : > { %v2400_v63 = vpop.f32.mrb[17].mxu1  ;;  %2236 = vst [vmem:[%s3100_s15 + $0x10] sm:$0xff] %v2228_v57   ;;  %v1935_v1 = vadd.f32 %v1934_v56, %v1927_v59  ;;  %v2498_v5 = vadd.f32 %v1757_v61, %v1018_v14  ;;  %v2484_v6 = vpop.f32.mrb[13].mxu0 }
 0x18f   : > { %v1029_v7 = vpop.f32.mrb[18].mxu1  ;;  %v1760_v8 = vpop.f32.mrb[14].mxu0 }
 0x190   : > { %v2401_v9 = vpop.f32.mrb[19].mxu1  ;;  %v1858_v10 = vmul.f32 %v2498_v5, %v1840_v55  ;;  %v2499_v11 = vadd.f32 %v1760_v8, %v1021_v37  ;;  %v2485_v12 = vpop.f32.mrb[15].mxu0 }
 0x192   : > { %v1912_v15 = vadd.f32 %v1911_v58, %v1858_v10  ;;  %v1928_v16 = vmul.f32 %v1858_v10, %v1858_v10  ;;  %v1859_v2 = vmul.f32 %v2499_v11, %v1845_v13 }
 0x194   : > { %v1936_v17 = vadd.f32 %v1935_v1, %v1928_v16  ;;  %v2233_v18 = vpack.c.bf16 %v1859_v2, %v1858_v10  ;;  %v1913_v19 = vadd.f32 %v1912_v15, %v1859_v2  ;;  %v1929_v20 = vmul.f32 %v1859_v2, %v1859_v2 }
 0x195   : > { %v1765_v21 = vpop.f32.mrb[16].mxu0 }
 0x196   : > { %2237 = vst [vmem:[%s3100_s15 + $0x18] sm:$0xff] %v2233_v18   ;;  %v1937_v22 = vadd.f32 %v1936_v17, %v1929_v20  ;;  %v2500_v23 = vadd.f32 %v1765_v21, %v1026_v60  ;;  %v2488_v24 = vpop.f32.mrb[17].mxu0 }
 0x197   : > { %v1768_v27 = vpop.f32.mrb[18].mxu0 }
 0x198   : > { %v1860_v31 = vmul.f32 %v2500_v23, %v1850_v26  ;;  %v2489_v32 = vpop.f32.mrb[19].mxu0 }
 0x19a   : > { %v2214_v33 = vpack.c.bf16 %v1860_v31, %v1860_v31  ;;  %v1914_v34 = vadd.f32 %v1913_v19, %v1860_v31  ;;  %v1930_v36 = vmul.f32 %v1860_v31, %v1860_v31 }
 0x19c   : > { %1906 = vst [vmem:[%s3100_s15 + $0x20] sm:$0xf] %v2214_v33  ;;  %v1915_v38 = vrot.slane %v1914_v34, 4  ;;  %v1938_v39 = vadd.f32 %v1937_v22, %v1930_v36 }
 0x19e   : > { %v1916_v42 = vadd.f32 %v1915_v38, %v1914_v34  ;;  %v1939_v41 = vrot.slane %v1938_v39, 4 }
 0x1a0   : > { %v1917_v43 = vrot.slane %v1916_v42, 2  ;;  %v1940_v40 = vadd.f32 %v1939_v41, %v1938_v39 }
 0x1a2   : > { %v1918_v45 = vadd.f32 %v1917_v43, %v1916_v42  ;;  %v1941_v53 = vrot.slane %v1940_v40, 2 }
 0x1a4   : > { %v1919_v62 = vrot.slane %v1918_v45, 1  ;;  %v1942_v51 = vadd.f32 %v1941_v53, %v1940_v40 }
 0x1a6   : > { %v1920_v0 = vadd.f32 %v1919_v62, %v1918_v45  ;;  %v1943_v4 = vrot.slane %v1942_v51, 1 }
 0x1a8   : > { %1921 = vst [vmem:[%s238_s20] sm:$0x1] %v1920_v0  ;;  %v1944_v14 = vadd.f32 %v1943_v4, %v1942_v51 }
 0x1aa   : > { %1945 = vst [vmem:[%s241_s23] sm:$0x1] %v1944_v14 }
 0x1ab PF: > { %s16_s18 = sadd.s32 1, %s2707_s18  }
 0x1ac   : > { %p13_p4 = scmp.ge.s32.totalorder %s16_s18, 4  }
 0x1ae   :  { %15 = sbr.rel (!%p13_p4) target bundleno = 1 (0x1), region = 89 }

// kernel: rir_block_apply.7
= control target key start
LH: loop header
LB: loop body
LE: loop exit
PB: predicated region body
PF: predicated region fallthrough
CT: control target
= control target key end

     0   :  { %s512_s15 = smov 0   ;;  %s551_s0 = inlined_call_operand.vmem [shape: bf16[2,80,128], index: 0, kind: input, shape index: {}]   ;;  %s552_s1 = inlined_call_operand.vmem [shape: f32[2,1,128], index: 1, kind: input, shape index: {}]   ;;  %s553_s2 = inlined_call_operand.vmem [shape: f32[2,1,128], index: 2, kind: input, shape index: {}]   ;;  %s554_s3 = inlined_call_operand.vmem [shape: f32[2,128], index: 3, kind: input, shape index: {}]   ;;  %s555_s4 = inlined_call_operand.vmem [shape: bf16[2,80,128], index: 4, kind: output, shape index: {}]  }
   0x1 LB: > { %s386_s16 = sadd.s32 4294967295, %s485_s15   ;;  %p390_p0 = scmp.ge.s32.totalorder %s485_s15, 1  ;;  %s485_s15 = sphi %s512_s15, %s14_s15  }
   0x2   : > { %p162_p1 = scmp.lt.s32.totalorder %s485_s15, 3 }
   0x4   : > { %p163_p2 = pnand %p390_p0, %p162_p1 }
   0x5   : > { %v198_v0 = vld [vmem:[%s552_s1] sm:$0x1] (!%p163_p2)  ;;  %v199_v1 = vld [vmem:[%s552_s1 + $0x1] sm:$0x1] (!%p163_p2)  ;;  %vm200_vm0 = vcmask (!%p163_p2), 1040384   ;;  %p188_p3 = scmp.lt.s32.totalorder (!%p163_p2), %s386_s16, 1  ;;  %v243_v16 = vlaneseq (!%p163_p2) }
   0x6   : > { %166 = sbr.rel (%p163_p2) target bundleno = 51 (0x33), region = 36  ;;  %v201_v2 = vsel (!%p163_p2), %vm200_vm0, %v198_v0, 0.0  ;;  %v202_v3 = vsel (!%p163_p2), %vm200_vm0, %v199_v1, 0.0  ;;  %v204_v4 = vld [vmem:[%s553_s2] sm:$0x1] (!%p163_p2) }
   0x7   : > { %v205_v5 = vld [vmem:[%s553_s2 + $0x1] sm:$0x1] (!%p163_p2)  ;;  %v203_v6 = vadd.f32 (!%p163_p2), %v202_v3, %v201_v2  ;;  %v206_v7 = vsel (!%p163_p2), %vm200_vm0, %v204_v4, 0.0  ;;  %v244_v17 = vshrl.u32 (!%p163_p2), %v243_v16, 7 }
   0x8   : > { %v207_v8 = vsel (!%p163_p2), %vm200_vm0, %v205_v5, 0.0  ;;  %v214_v18 = vld [vmem:[%s554_s3] sm:$0x3] (!%p163_p2) }
   0x9   : > { %v208_v9 = vadd.f32 (!%p163_p2), %v207_v8, %v206_v7  ;;  %v209_v10 = vmul.f32 (!%p163_p2), 0.0078125, %v203_v6  ;;  %v245_v20 = vsub.s32 (!%p163_p2), 0, %v244_v17  ;;  %v259_v38 = vsub.s32 (!%p163_p2), 1, %v244_v17 }
   0xb   : > { %v210_v11 = vmul.f32 (!%p163_p2), 0.0078125, %v208_v9  ;;  %v211_v12 = vmul.f32 (!%p163_p2), %v209_v10, %v209_v10 }
   0xd   : > { %v212_v13 = vsub.f32 %v210_v11, %v211_v12  ;;  %s557_s16 = smov (!%p188_p3, %s386_s16), 1 }
   0xe   : > { %s468_s25 = smul.u32 40, %s557_s16 }
   0xf   : > { %v213_v14 = vmax.f32 %v212_v13, 0.0 }
  0x10   : > { %s192_s28 = scalar_lea.vmem %s551_s0, %s468_s25  ;;  %s197_s7 = scalar_lea.vmem %s555_s4, %s468_s25 }
  0x11   : > { %v215_v15 = vadd.f32 1e-05, %v213_v14  ;;  %v416_v19 = vld [vmem:[%s192_s28] sm:$0xff]   ;;  %v460_v22 = vld [vmem:[%s192_s28 + $0x8] sm:$0xff]   ;;  %v461_v24 = vld [vmem:[%s192_s28 + $0x10] sm:$0xff]  }
  0x12   : > { %v462_v25 = vld [vmem:[%s192_s28 + $0x18] sm:$0xff]   ;;  %v417_v26 = vunpack.c.l.bf16 %v416_v19  ;;  %v418_v27 = vunpack.c.h.bf16 %v416_v19  ;;  %v421_v30 = vunpack.c.l.bf16 %v460_v22  ;;  %v422_v31 = vunpack.c.h.bf16 %v460_v22  ;;  %v463_v32 = vld [vmem:[%s192_s28 + $0x20] sm:$0xff]  }
  0x13   : > { %477 = vrsqrt.f32 %v215_v15  ;;  %v425_v33 = vunpack.c.l.bf16 %v461_v24  ;;  %v426_v34 = vunpack.c.h.bf16 %v461_v24  ;;  %v429_v35 = vunpack.c.l.bf16 %v462_v25 }
  0x14   : > { %v430_v36 = vunpack.c.h.bf16 %v462_v25  ;;  %v433_v40 = vunpack.c.l.bf16 %v463_v32  ;;  %v434_v41 = vunpack.c.h.bf16 %v463_v32 }
  0x1d   : > { %v478_v21 = vpop.eup %477 }
  0x1e   : > { %v217_v23 = vmul.f32 %v478_v21, %v214_v18 }
  0x20   : > { %v218_v28 = vmul.f32 %v217_v23, %v209_v10  ;;  %v246_v29 = vrot.slane %v217_v23, %v245_v20 }
  0x22   : > { %v220_v37 = vrot.slane %v218_v28, 7  ;;  %v247_v39 = vmul.f32 %v417_v26, %v246_v29  ;;  %v248_v43 = vmul.f32 %v418_v27, %v246_v29  ;;  %v249_v44 = vmul.f32 %v421_v30, %v246_v29 }
  0x23   : > { %v250_v45 = vmul.f32 %v422_v31, %v246_v29  ;;  %v251_v46 = vmul.f32 %v425_v33, %v246_v29  ;;  %v252_v47 = vmul.f32 %v426_v34, %v246_v29  ;;  %v253_v48 = vmul.f32 %v429_v35, %v246_v29 }
  0x24   : > { %v222_v42 = vsub.f32 %v214_v18, %v220_v37  ;;  %v254_v49 = vmul.f32 %v430_v36, %v246_v29  ;;  %v255_v51 = vmul.f32 %v433_v40, %v246_v29  ;;  %v256_v52 = vmul.f32 %v434_v41, %v246_v29 }
  0x26   : > { %v260_v50 = vrot.slane %v222_v42, %v259_v38 }
  0x28   : > { %v261_v53 = vadd.f32 %v260_v50, %v247_v39  ;;  %v262_v54 = vadd.f32 %v260_v50, %v248_v43  ;;  %v263_v55 = vadd.f32 %v260_v50, %v249_v44  ;;  %v264_v56 = vadd.f32 %v260_v50, %v250_v45 }
  0x29   : > { %v265_v57 = vadd.f32 %v260_v50, %v251_v46  ;;  %v266_v58 = vadd.f32 %v260_v50, %v252_v47  ;;  %v267_v59 = vadd.f32 %v260_v50, %v253_v48  ;;  %v268_v60 = vadd.f32 %v260_v50, %v254_v49 }
  0x2a   : > { %v271_v61 = vmax.f32 %v261_v53, 0.0  ;;  %v272_v62 = vmax.f32 %v262_v54, 0.0  ;;  %v273_v63 = vmax.f32 %v263_v55, 0.0  ;;  %v274_v0 = vmax.f32 %v264_v56, 0.0 }
  0x2b   : > { %v275_v1 = vmax.f32 %v265_v57, 0.0  ;;  %v276_v2 = vmax.f32 %v266_v58, 0.0  ;;  %v277_v3 = vmax.f32 %v267_v59, 0.0  ;;  %v278_v4 = vmax.f32 %v268_v60, 0.0 }
  0x2c   : > { %v438_v5 = vpack.c.bf16 %v272_v62, %v271_v61  ;;  %v443_v6 = vpack.c.bf16 %v274_v0, %v273_v63  ;;  %v269_v7 = vadd.f32 %v260_v50, %v255_v51  ;;  %v270_v8 = vadd.f32 %v260_v50, %v256_v52 }
  0x2d   : > { %v448_v9 = vpack.c.bf16 %v276_v2, %v275_v1  ;;  %v453_v10 = vpack.c.bf16 %v278_v4, %v277_v3 }
  0x2e   : > { %439 = vst [vmem:[%s197_s7] sm:$0xff] %v438_v5   ;;  %464 = vst [vmem:[%s197_s7 + $0x8] sm:$0xff] %v443_v6   ;;  %v279_v11 = vmax.f32 %v269_v7, 0.0  ;;  %v280_v12 = vmax.f32 %v270_v8, 0.0 }
  0x2f   : > { %465 = vst [vmem:[%s197_s7 + $0x10] sm:$0xff] %v448_v9   ;;  %466 = vst [vmem:[%s197_s7 + $0x18] sm:$0xff] %v453_v10  }
  0x30   : > { %v458_v13 = vpack.c.bf16 %v280_v12, %v279_v11 }
  0x32   : > { %467 = vst [vmem:[%s197_s7 + $0x20] sm:$0xff] %v458_v13  }
  0x33 PF: > { %s14_s15 = sadd.s32 1, %s485_s15  }
  0x34   : > { %p11_p4 = scmp.ge.s32.totalorder %s14_s15, 4  }
  0x36   :  { %13 = sbr.rel (!%p11_p4) target bundleno = 1 (0x1), region = 66 }

// kernel: rir_block_apply.6
= control target key start
LH: loop header
LB: loop body
LE: loop exit
PB: predicated region body
PF: predicated region fallthrough
CT: control target
= control target key end

     0   :  { %s2910_s18 = smov 0   ;;  %s3283_s0 = inlined_call_operand.vmem [shape: bf16[2,1,110,16], index: 0, kind: input, shape index: {}]   ;;  %s3284_s1 = inlined_call_operand.vmem [shape: bf16[144,128], index: 1, kind: input, shape index: {}]   ;;  %s3285_s2 = inlined_call_operand.vmem [shape: f32[80,1], index: 2, kind: input, shape index: {}]   ;;  %s3286_s3 = inlined_call_operand.vmem [shape: bf16[2,80,128], index: 3, kind: output, shape index: {0}]   ;;  %s3287_s4 = inlined_call_operand.vmem [shape: f32[2,1,128], index: 4, kind: output, shape index: {1}]   ;;  %s3288_s5 = inlined_call_operand.vmem [shape: f32[2,1,128], index: 5, kind: output, shape index: {2}]  }
   0x1 LB: > { %s2223_s19 = sadd.s32 4294967295, %s2875_s18   ;;  %p2227_p0 = scmp.ge.s32.totalorder %s2875_s18, 1  ;;  %s2875_s18 = sphi %s2910_s18, %s16_s18  }
   0x2   : > { %p192_p1 = scmp.lt.s32.totalorder %s2875_s18, 3 }
   0x4   : > { %p193_p2 = pnand %p2227_p0, %p192_p1 }
   0x5   : > { %v2807_v0 = vld [vmem:[%s3284_s1] sm:$0xff] (!%p193_p2)   ;;  %v2877_v1 = vmov (!%p193_p2), 0.0   ;;  %p226_p3 = scmp.lt.s32.totalorder (!%p193_p2), %s2223_s19, 1  ;;  %vm2878_vm0 = vmmov (!%p193_p2), 0   ;;  %vm306_vm1 = vcmask (!%p193_p2), 130048   ;;  %v2814_v3 = vld [vmem:[%s3284_s1 + $0x8] sm:$0xff] (!%p193_p2)  }
   0x6   : > { %196 = sbr.rel (%p193_p2) target bundleno = 437 (0x1b5), region = 32  ;;  %2442 = vmatprep.subr.bf16.mxu1 (!%p193_p2), %v2877_v1  ;;  %2530 = vmatprep.subr.bf16.mxu0 (!%p193_p2), %v2877_v1  ;;  %v2926_v2 = vld [vmem:[%s3284_s1 + $0x20] sm:$0xff] (!%p193_p2)   ;;  %vm1029_vm2 = vsmask.f32 (!%p193_p2), 6400  ;;  %v2812_v17 = vld [vmem:[%s3284_s1 + $0x28] sm:$0xff] (!%p193_p2)   ;;  %vm1248_vm3 = vcmask (!%p193_p2), 1045504  }
   0x7   : > { %2443 = vmatpush3.bf16.msra.mxu1 (!%p193_p2), %v2807_v0  ;;  %2444 = vmatprep.mubr.msk.bf16.mxu1 (!%p193_p2), %vm2878_vm0, %v2877_v1  ;;  %v2821_v43 = vld [vmem:[%s3284_s1 + $0x30] sm:$0xff] (!%p193_p2)   ;;  %vm466_vm4 = vsmask.f32 (!%p193_p2), 7424  ;;  %vm676_vm5 = vcmask (!%p193_p2), 1046528   ;;  %vm1601_vm6 = vsmask.f32 (!%p193_p2), 5376 }
   0x8   : > { %2531 = vmatpush3.bf16.msra.mxu0 (!%p193_p2), %v2926_v2  ;;  %2532 = vmatprep.mubr.msk.bf16.mxu0 (!%p193_p2), %vm2878_vm0, %v2877_v1  ;;  %vm1820_vm7 = vcmask (!%p193_p2), 1044480  }
   0x9   : > { %2552 = vmatprep.subr.bf16.mxu0 (!%p193_p2), %v2877_v1  ;;  %2464 = vmatprep.subr.bf16.mxu1 (!%p193_p2), %v2877_v1 }
   0xd   : > { %s3290_s19 = smov (!%p226_p3, %s2223_s19), 1 }
   0xe   : > { %s2792_s24 = smul.u32 56, %s3290_s19  ;;  %s238_s22 = scalar_lea.vmem %s3287_s4, %s3290_s19 }
   0xf   : > { %s241_s25 = scalar_lea.vmem %s3288_s5, %s3290_s19 }
  0x10   : > { %s2941_s27 = scalar_lea.vmem %s3283_s0, %s2792_s24 }
  0x11   : > { %v2808_v4 = vld [vmem:[%s2941_s27] sm:$0xff]   ;;  %v2811_v6 = vld [vmem:[%s2941_s27 + $0xc] sm:$0xff]   ;;  %v2815_v12 = vld [vmem:[%s2941_s27 + $0x14] sm:$0xff]  }
  0x12   : > { %2445 = vmatmul.mubr.msk.bf16.vlgmr.msra.gmra.mrb[0].mxu1 %vm306_vm1, %v2808_v4  ;;  %v2810_v5 = vld [vmem:[%s2941_s27 + $0x4] sm:$0xfe]   ;;  %v1039_v9 = vshrl.u32 %v2811_v6, 16  ;;  %v1042_v10 = vshll.u32 %v2811_v6, 16  ;;  %v1048_v18 = vshrl.u32 %v2815_v12, 16  ;;  %v1051_v19 = vshll.u32 %v2815_v12, 16 }
  0x13   : > { %2448 = vmatprep.mubr.msk.bf16.mxu1 %vm2878_vm0, %v2877_v1  ;;  %2465 = vmatpush3.bf16.msra.mxu1 %v2814_v3  ;;  %v1031_v7 = vshrl.u32 %v2810_v5, 16  ;;  %v1034_v8 = vshll.u32 %v2810_v5, 16  ;;  %v2813_v11 = vld [vmem:[%s2941_s27 + $0x8] sm:$0xff]   ;;  %v2817_v20 = vld [vmem:[%s2941_s27 + $0x1c] sm:$0xff]   ;;  %v2816_v29 = vld [vmem:[%s2941_s27 + $0x10] sm:$0xff]  }
  0x14   : > { %2486 = vmatprep.subr.bf16.mxu1 %v2877_v1  ;;  %v1041_v15 = vrot.slane %v1039_v9, 1  ;;  %v1044_v16 = vrot.slane %v1042_v10, 2  ;;  %v1050_v23 = vrot.slane %v1048_v18, 1  ;;  %v1053_v24 = vrot.slane %v1051_v19, 2  ;;  %v2818_v34 = vld [vmem:[%s2941_s27 + $0x18] sm:$0xff]   ;;  %v2824_v35 = vld [vmem:[%s2941_s27] sm:$0xff]  }
  0x15   : > { %v1033_v13 = vrot.slane %v1031_v7, 1  ;;  %v1036_v14 = vrot.slane %v1034_v8, 2  ;;  %v1057_v27 = vshrl.u32 %v2817_v20, 16  ;;  %v1060_v28 = vshll.u32 %v2817_v20, 16  ;;  %v2819_v37 = vld [vmem:[%s2941_s27 + $0x4] sm:$0xfc]  }
  0x16   : > { %v1045_v22 = vor.u32 %v1044_v16, %v1041_v15  ;;  %v1054_v26 = vor.u32 %v1053_v24, %v1050_v23  ;;  %v2820_v38 = vld [vmem:[%s2941_s27 + $0xc] sm:$0xff]   ;;  %v470_v40 = vshll.u32 %v2824_v35, 16  ;;  %v1249_v41 = vrot.slane %v2819_v37, 2  ;;  %v2822_v44 = vld [vmem:[%s2941_s27 + $0x20] sm:$0xff]   ;;  %v2823_v45 = vld [vmem:[%s2941_s27 + $0x14] sm:$0xff]  }
  0x17   : > { %v1037_v21 = vor.u32 %v1036_v14, %v1033_v13  ;;  %v1059_v31 = vrot.slane %v1057_v27, 1  ;;  %v1062_v32 = vrot.slane %v1060_v28, 2  ;;  %v2825_v39 = vld [vmem:[%s2941_s27 + $0x8] sm:$0xff]   ;;  %v1250_v42 = vrot.slane %v2820_v38, 2  ;;  %v2996_v49 = vld [vmem:[%s2941_s27 + $0x20] sm:$0xff]   ;;  %v2827_v51 = vld [vmem:[%s2941_s27 + $0x10] sm:$0xff]  }
  0x18   : > { %v1055_v30 = vsel %vm1029_vm2, %v1045_v22, %v1054_v26  ;;  %v468_v46 = vshrl.u32 %v2824_v35, 16  ;;  %v475_v47 = vshll.u32 %v2825_v39, 16  ;;  %v472_v48 = vrot.slane %v470_v40, 1  ;;  %v2843_v53 = vld [vmem:[%s2941_s27 + $0x28] sm:$0xff]   ;;  %v2826_v3 = vld [vmem:[%s2941_s27 + $0x1c] sm:$0xff]   ;;  %v2828_v4 = vld [vmem:[%s3284_s1 + $0x10] sm:$0xff]  }
  0x19   : > { %v1046_v25 = vsel %vm1029_vm2, %v1037_v21, %v1045_v22  ;;  %v2975_v33 = vor.u32 %v1062_v32, %v1059_v31  ;;  %v1251_v50 = vsel %vm1248_vm3, %v1249_v41, %v1250_v42  ;;  %v1252_v52 = vrot.slane %v2823_v45, 2  ;;  %v2845_v58 = vld [vmem:[%s2941_s27 + $0x30] ss:$0 sps:$4 sm:$0x33]   ;;  %v2830_v6 = vld [vmem:[%s2941_s27 + $0x18] sm:$0xff]   ;;  %v2829_v14 = vld [vmem:[%s2941_s27 + $0x24] sm:$0xff]  }
  0x1a   : > { %2449 = vmatmul.mubr.msk.bf16.gmra.mrb[4].mxu1 %vm306_vm1, %v2813_v11  ;;  %2533 = vmatmul.mubr.msk.bf16.vlgmr.msra.gmra.mrb[0].mxu0 %vm306_vm1, %v1046_v25  ;;  %v473_v54 = vor.u32 %v472_v48, %v468_v46  ;;  %v477_v55 = vrot.slane %v475_v47, 1  ;;  %v1430_v56 = vrot.slane %v2996_v49, 2  ;;  %v1432_v57 = vrot.slane %v2843_v53, 2  ;;  %v2832_v15 = vld [vmem:[%s2941_s27 + $0x20] sm:$0xff]   ;;  %v2834_v53 = vld [vmem:[%s2941_s27 + $0x10] sm:$0xff]  }
  0x1b   : > { %2452 = vmatprep.mubr.msk.bf16.mxu1 %vm2878_vm0, %v2877_v1  ;;  %2553 = vmatpush3.bf16.msra.mxu0 %v2812_v17  ;;  %v1064_v36 = vsel %vm1029_vm2, %v1054_v26, %v2975_v33  ;;  %v1434_v60 = vrot.slane %v2845_v58, 2  ;;  %v479_v62 = vshrl.u32 %v2825_v39, 16  ;;  %v483_v63 = vshll.u32 %v2827_v51, 16  ;;  %v3041_v18 = vld [vmem:[%s2941_s27 + $0x1c] sm:$0xff]   ;;  %v2859_v20 = vld [vmem:[%s2941_s27 + $0x24] sm:$0xff]  }
  0x1c   : > { %2536 = vmatprep.mubr.msk.bf16.mxu0 %vm2878_vm0, %v2877_v1  ;;  %2574 = vmatprep.subr.bf16.mxu0 %v2877_v1  ;;  %v3013_v59 = vsel %vm1248_vm3, %v1430_v56, %v1432_v57  ;;  %v478_v61 = vsel %vm466_vm4, %v473_v54, %v477_v55  ;;  %v1253_v0 = vsel %vm1248_vm3, %v1250_v42, %v1252_v52  ;;  %v1254_v9 = vrot.slane %v2826_v3, 2  ;;  %v2831_v21 = vld [vmem:[%s2941_s27 + $0x2c] ss:$0 sps:$4 sm:$0x33]  }
  0x1d   : > { %v3022_v5 = vsel %vm1248_vm3, %v1432_v57, %v1434_v60  ;;  %v481_v7 = vor.u32 %v479_v62, %v477_v55  ;;  %v485_v8 = vrot.slane %v483_v63, 1  ;;  %v487_v10 = vshrl.u32 %v2827_v51, 16  ;;  %v2836_v28 = vld [vmem:[%s2941_s27 + $0x28] ss:$0 sps:$4 sm:$0x11]   ;;  %v1958_v55 = vld [vmem:[%s3285_s2 + $0x10] sm:$0xff] }
  0x1e   : > { %v491_v11 = vshll.u32 %v2830_v6, 16  ;;  %v1255_v13 = vsel %vm1248_vm3, %v1252_v52, %v1254_v9  ;;  %v1256_v19 = vrot.slane %v2829_v14, 2  ;;  %v495_v22 = vshrl.u32 %v2830_v6, 16  ;;  %v2862_v31 = vld [vmem:[%s2941_s27 + $0x2c] ss:$0 sps:$4 sm:$0x11]  }
  0x1f   : > { %v486_v12 = vsel %vm466_vm4, %v481_v7, %v485_v8  ;;  %v489_v16 = vor.u32 %v487_v10, %v485_v8  ;;  %v499_v23 = vshll.u32 %v2832_v15, 16  ;;  %v858_v24 = vrot.slane %v3041_v18, 1  ;;  %v2866_v42 = vld [vmem:[%s2941_s27 + $0x2c] ss:$0 sps:$4 sm:$0x33]   ;;  %v1959_v62 = vld [vmem:[%s3285_s2 + $0x18] sm:$0xff] }
  0x20   : > { %v493_v17 = vrot.slane %v491_v11, 1  ;;  %v860_v25 = vrot.slane %v2859_v20, 1  ;;  %v1257_v27 = vsel %vm1248_vm3, %v1254_v9, %v1256_v19  ;;  %v1258_v38 = vrot.slane %v2831_v21, 2  ;;  %v2833_v52 = vld [vmem:[%s2941_s27 + $0x8] sm:$0xfc]   ;;  %v1960_v7 = vld [vmem:[%s3285_s2 + $0x20] sm:$0xff] }
  0x21   : > { %v507_v45 = vshll.u32 %v2836_v28, 16  ;;  %v1075_v47 = vshrl.u32 %v2866_v42, 16  ;;  %v1078_v48 = vshll.u32 %v2866_v42, 16  ;;  %v2879_v54 = vmov 0   ;;  %v1961_v8 = vld [vmem:[%s3285_s2 + $0x28] sm:$0xff]  ;;  %v2837_v14 = vld [vmem:[%s2941_s27 + $0x18] sm:$0xff]  }
  0x22   : > { %2453 = vmatmul.mubr.msk.bf16.gmra.mrb[8].mxu1 %vm306_vm1, %v2816_v29  ;;  %2537 = vmatmul.mubr.msk.bf16.gmra.mrb[4].mxu0 %vm306_vm1, %v1055_v30  ;;  %v494_v26 = vsel %vm466_vm4, %v489_v16, %v493_v17  ;;  %v3054_v29 = vsel %vm676_vm5, %v858_v24, %v860_v25  ;;  %v2864_v30 = vld [vmem:[%s2941_s27 + $0x24] sm:$0xff]   ;;  %v497_v32 = vor.u32 %v495_v22, %v493_v17  ;;  %v1425_v3 = vrot.slane %v2833_v52, 2 }
  0x23   : > { %2456 = vmatprep.mubr.msk.bf16.mxu1 %vm2878_vm0, %v2877_v1  ;;  %2540 = vmatprep.mubr.msk.bf16.mxu0 %vm2878_vm0, %v2877_v1  ;;  %v1066_v35 = vshrl.u32 %v2864_v30, 16  ;;  %v1069_v37 = vshll.u32 %v2864_v30, 16  ;;  %v1259_v51 = vsel %vm1248_vm3, %v1256_v19, %v1258_v38  ;;  %v1077_v58 = vrot.slane %v1075_v47, 1  ;;  %v2838_v10 = vld [vmem:[%s2941_s27] sm:$0xfe]   ;;  %v2839_v11 = vld [vmem:[%s2941_s27 + $0x8] sm:$0xff]  }
  0x24   : > { %2805 = vset.pattern.permute.xlu0 %v2879_v54  ;;  %2806 = vset.pattern.permute.xlu1 %v2879_v54  ;;  %v1080_v60 = vrot.slane %v1078_v48, 2  ;;  %v509_v63 = vrot.slane %v507_v45, 1  ;;  %v677_v16 = vrot.slane %v2838_v10, 1  ;;  %v678_v17 = vrot.slane %v2839_v11, 1  ;;  %v1963_v19 = vld [vmem:[%s3285_s2 + $0x38] sm:$0xff]  ;;  %v1964_v21 = vld [vmem:[%s3285_s2 + $0x40] sm:$0xff] }
  0x25   : > { %v1068_v39 = vrot.slane %v1066_v35, 1  ;;  %v1071_v41 = vrot.slane %v1069_v37, 2  ;;  %1978 = vperm.xlu1 %2806, %v1958_v55   ;;  %v1428_v20 = vrot.slane %v2837_v14, 2  ;;  %v2847_v37 = vld [vmem:[%s2941_s27 + $0x8] sm:$0xfc]   ;;  %v2848_v38 = vld [vmem:[%s2941_s27 + $0x10] sm:$0xff]  }
  0x26   : > { %v679_v22 = vsel %vm676_vm5, %v677_v16, %v678_v17  ;;  %v1614_v42 = vshll.u32 %v2848_v38, 16  ;;  %v2851_v48 = vld [vmem:[%s2941_s27 + $0x18] sm:$0xff]   ;;  %v2856_v14 = vld [vmem:[%s2941_s27 + $0x28] sm:$0xff]  }
  0x27   : > { %v1072_v46 = vor.u32 %v1071_v41, %v1068_v39  ;;  %v1606_v39 = vshll.u32 %v2847_v37, 16  ;;  %v1611_v41 = vshrl.u32 %v2848_v38, 16  ;;  %v1623_v54 = vshll.u32 %v2851_v48, 16  ;;  %v2855_v10 = vld [vmem:[%s2941_s27 + $0x14] sm:$0xff]  }
  0x29   : > { %v3080_v57 = vsel %vm1029_vm2, %v2975_v33, %v1072_v46  ;;  %1983 = vperm.xlu1 %2806, %v1959_v62   ;;  %v1613_v47 = vrot.slane %v1611_v41, 2 }
  0x2a   : > { %2457 = vmatmul.mubr.msk.bf16.gmra.mrb[12].mxu1 %vm306_vm1, %v2818_v34  ;;  %2541 = vmatmul.mubr.msk.bf16.gmra.mrb[8].mxu0 %vm306_vm1, %v1064_v36  ;;  %v501_v34 = vrot.slane %v499_v23, 1  ;;  %v862_v36 = vrot.slane %v2862_v31, 1  ;;  %v2841_v23 = vld [vmem:[%s2941_s27 + $0x10] sm:$0xff]   ;;  %v2844_v31 = vld [vmem:[%s2941_s27 + $0x18] sm:$0xff]  }
  0x2b   : > { %2460 = vmatprep.mubr.msk.bf16.mxu1 %vm2878_vm0, %v2877_v1  ;;  %2554 = vmatprep.mubr.msk.bf16.mxu0 %vm2878_vm0, %v2877_v1  ;;  %v680_v28 = vrot.slane %v2841_v23, 1 }
  0x2c   : > { %v3065_v40 = vsel %vm676_vm5, %v860_v25, %v862_v36  ;;  %v1965_v25 = vld [vmem:[%s3285_s2 + $0x48] sm:$0xff]  ;;  %v2846_v36 = vld [vmem:[%s2941_s27 + $0x20] sm:$0xff]  }
  0x2d   : > { %1993 = vperm.xlu1 %2806, %v1961_v8   ;;  %v681_v30 = vsel %vm676_vm5, %v678_v17, %v680_v28  ;;  %v684_v49 = vrot.slane %v2846_v36, 1  ;;  %v1638_v17 = vshrl.u32 %v2856_v14, 16 }
  0x31   : > { %2003 = vperm.xlu1 %2806, %v1963_v19   ;;  %v1641_v19 = vshll.u32 %v2856_v14, 16 }
  0x32   : > { %2461 = vmatmul.mubr.msk.bf16.gmra.mrb[16].mxu1 %vm306_vm1, %v2822_v44  ;;  %2555 = vmatmul.mubr.msk.bf16.vlgmr.msra.gmra.mrb[0].mxu0 %vm306_vm1, %v1251_v50  ;;  %v503_v44 = vshrl.u32 %v2832_v15, 16  ;;  %v1956_v50 = vld [vmem:[%s3285_s2] sm:$0xff]  ;;  %v1962_v15 = vld [vmem:[%s3285_s2 + $0x30] sm:$0xff] }
  0x33   : > { %2466 = vmatprep.mubr.msk.bf16.mxu1 %vm2878_vm0, %v2877_v1  ;;  %2575 = vmatpush3.bf16.msra.mxu0 %v2821_v43  ;;  %v502_v43 = vsel %vm466_vm4, %v497_v32, %v501_v34  ;;  %v1431_v32 = vsel %vm1248_vm3, %v1428_v20, %v1430_v56  ;;  %v1603_v56 = vshrl.u32 %v2847_v37, 16  ;;  %v1643_v23 = vrot.slane %v1641_v19, 3 }
  0x34   : > { %2558 = vmatprep.mubr.msk.bf16.mxu0 %vm2878_vm0, %v2877_v1  ;;  %2596 = vmatprep.subr.bf16.mxu0 %v2877_v1  ;;  %v505_v33 = vor.u32 %v503_v44, %v501_v34  ;;  %v682_v34 = vrot.slane %v2844_v31, 1  ;;  %v2850_v44 = vld [vmem:[%s2941_s27 + $0x28] ss:$0 sps:$4 sm:$0x11]  }
  0x35   : > { %1968 = vperm.xlu0 %2805, %v1956_v50   ;;  %2013 = vperm.xlu1 %2806, %v1965_v25   ;;  %v1605_v45 = vrot.slane %v1603_v56, 2  ;;  %v686_v50 = vrot.slane %v2850_v44, 1  ;;  %v2858_v25 = vld [vmem:[%s2941_s27 + $0x30] ss:$0 sps:$4 sm:$0x77]  }
  0x36   : > { %v510_v9 = vsel %vm466_vm4, %v505_v33, %v509_v63  ;;  %v683_v35 = vsel %vm676_vm5, %v680_v28, %v682_v34  ;;  %v1625_v33 = vrot.slane %v1623_v54, 3  ;;  %v2854_v63 = vld [vmem:[%s2941_s27 + $0x20] sm:$0xff]   ;;  %v2868_v44 = vld [vmem:[%s2941_s27 + $0x30] ss:$0 sps:$4 sm:$0x77]  }
  0x37   : > { %v687_v55 = vsel %vm676_vm5, %v684_v49, %v686_v50  ;;  %v1632_v8 = vshll.u32 %v2854_v63, 16 }
  0x3a   : > { %2467 = vmatmul.mubr.msk.bf16.vlgmr.msra.gmra.mrb[0].mxu1 %vm306_vm1, %v478_v61  ;;  %2559 = vmatmul.mubr.msk.bf16.gmra.mrb[4].mxu0 %vm306_vm1, %v1253_v0  ;;  %v1957_v61 = vld [vmem:[%s3285_s2 + $0x8] sm:$0xff]  ;;  %v1081_v0 = vor.u32 %v1080_v60, %v1077_v58 }
  0x3b   : > { %2470 = vmatprep.mubr.msk.bf16.mxu1 %vm2878_vm0, %v2877_v1  ;;  %2562 = vmatprep.mubr.msk.bf16.mxu0 %vm2878_vm0, %v2877_v1  ;;  %v2852_v58 = vld [vmem:[%s2941_s27 + $0x4] sm:$0xfe]   ;;  %v2853_v60 = vld [vmem:[%s2941_s27 + $0xc] sm:$0xff]  }
  0x3c   : > { %2487 = vmatpush3.bf16.msra.mxu1 %v2828_v4  ;;  %v1426_v4 = vrot.slane %v2834_v53, 2  ;;  %v3095_v6 = vsel %vm1029_vm2, %v1072_v46, %v1081_v0  ;;  %1973 = vperm.xlu0 %2805, %v1957_v61   ;;  %v1608_v46 = vrot.slane %v1606_v39, 3  ;;  %v1620_v53 = vshrl.u32 %v2851_v48, 16  ;;  %v2865_v39 = vld [vmem:[%s2941_s27 + $0x20] sm:$0xff]  }
  0x3d   : > { %2508 = vmatprep.subr.bf16.mxu1 %v2877_v1  ;;  %v853_v0 = vrot.slane %v2852_v58, 1 }
  0x3e   : > { %v1622_v62 = vrot.slane %v1620_v53, 2 }
  0x40   : > { %1988 = vperm.xlu0 %2805, %v1960_v7   ;;  %v1629_v7 = vshrl.u32 %v2854_v63, 16 }
  0x42   : > { %2471 = vmatmul.mubr.msk.bf16.gmra.mrb[4].mxu1 %vm306_vm1, %v486_v12  ;;  %2563 = vmatmul.mubr.msk.bf16.gmra.mrb[8].mxu0 %vm306_vm1, %v1255_v13  ;;  %v1427_v12 = vsel %vm1248_vm3, %v1425_v3, %v1426_v4  ;;  %v2835_v13 = vld [vmem:[%s3284_s1 + $0x38] sm:$0xff]   ;;  %v854_v3 = vrot.slane %v2853_v60, 1 }
  0x43   : > { %2474 = vmatprep.mubr.msk.bf16.mxu1 %vm2878_vm0, %v2877_v1  ;;  %2566 = vmatprep.mubr.msk.bf16.mxu0 %vm2878_vm0, %v2877_v1 }
  0x44   : > { %1998 = vperm.xlu0 %2805, %v1962_v15   ;;  %v856_v15 = vrot.slane %v2855_v10, 1 }
  0x46   : > { %v859_v28 = vsel %vm676_vm5, %v856_v15, %v858_v24  ;;  %v2861_v24 = vld [vmem:[%s2941_s27 + $0x10] sm:$0xff]  }
  0x47   : > { %v1822_v37 = vrot.slane %v2861_v24, 3 }
  0x48   : > { %2008 = vperm.xlu0 %2805, %v1964_v21  }
  0x4a   : > { %2475 = vmatmul.mubr.msk.bf16.gmra.mrb[8].mxu1 %vm306_vm1, %v494_v26  ;;  %2567 = vmatmul.mubr.msk.bf16.gmra.mrb[12].mxu0 %vm306_vm1, %v1257_v27  ;;  %v1429_v26 = vsel %vm1248_vm3, %v1426_v4, %v1428_v20  ;;  %v2842_v27 = vld [vmem:[%s3284_s1 + $0x18] sm:$0xff]   ;;  %v1626_v4 = vor.u32 %v1625_v33, %v1622_v62  ;;  %v857_v20 = vsel %vm676_vm5, %v854_v3, %v856_v15 }
  0x4b   : > { %2478 = vmatprep.mubr.msk.bf16.mxu1 %vm2878_vm0, %v2877_v1  ;;  %2570 = vmatprep.mubr.msk.bf16.mxu0 %vm2878_vm0, %v2877_v1 }
  0x52   : > { %2479 = vmatmul.mubr.msk.bf16.gmra.mrb[12].mxu1 %vm306_vm1, %v502_v43  ;;  %2571 = vmatmul.mubr.msk.bf16.gmra.mrb[16].mxu0 %vm306_vm1, %v1259_v51  ;;  %v685_v43 = vsel %vm676_vm5, %v682_v34, %v684_v49  ;;  %v1609_v51 = vor.u32 %v1608_v46, %v1605_v45  ;;  %v2863_v49 = vld [vmem:[%s2941_s27 + $0x18] sm:$0xff]   ;;  %v1830_v45 = vrot.slane %v2868_v44, 3 }
  0x53   : > { %2482 = vmatprep.mubr.msk.bf16.mxu1 %vm2878_vm0, %v2877_v1  ;;  %2576 = vmatprep.mubr.msk.bf16.mxu0 %vm2878_vm0, %v2877_v1 }
  0x5a   : > { %2483 = vmatmul.mubr.msk.bf16.gmra.mrb[16].mxu1 %vm306_vm1, %v510_v9  ;;  %2577 = vmatmul.mubr.msk.bf16.vlgmr.msra.gmra.mrb[0].mxu0 %vm306_vm1, %v1427_v12  ;;  %v855_v9 = vsel %vm676_vm5, %v853_v0, %v854_v3  ;;  %v1631_v12 = vrot.slane %v1629_v7, 2 }
  0x5b   : > { %2488 = vmatprep.mubr.msk.bf16.mxu1 %vm2878_vm0, %v2877_v1  ;;  %2597 = vmatpush3.bf16.msra.mxu0 %v2835_v13  ;;  %v1634_v13 = vrot.slane %v1632_v8, 3 }
  0x5c   : > { %2580 = vmatprep.mubr.msk.bf16.mxu0 %vm2878_vm0, %v2877_v1  ;;  %2618 = vmatprep.subr.bf16.mxu0 %v2877_v1 }
  0x5d   : > { %v1635_v16 = vor.u32 %v1634_v13, %v1631_v12 }
  0x5f   : > { %v1636_v21 = vsel %vm1601_vm6, %v1626_v4, %v1635_v16 }
  0x62   : > { %2489 = vmatmul.mubr.msk.bf16.vlgmr.msra.gmra.mrb[0].mxu1 %vm306_vm1, %v679_v22  ;;  %2581 = vmatmul.mubr.msk.bf16.gmra.mrb[4].mxu0 %vm306_vm1, %v1429_v26  ;;  %v1640_v22 = vrot.slane %v1638_v17, 2  ;;  %v1647_v26 = vshrl.u32 %v2858_v25, 16 }
  0x63   : > { %2492 = vmatprep.mubr.msk.bf16.mxu1 %vm2878_vm0, %v2877_v1  ;;  %2584 = vmatprep.mubr.msk.bf16.mxu0 %vm2878_vm0, %v2877_v1 }
  0x64   : > { %2509 = vmatpush3.bf16.msra.mxu1 %v2842_v27  ;;  %v1650_v27 = vshll.u32 %v2858_v25, 16  ;;  %v1649_v31 = vrot.slane %v1647_v26, 2 }
  0x65   : > { %2640 = vmatprep.subr.bf16.mxu1 %v2877_v1 }
  0x6a   : > { %2493 = vmatmul.mubr.msk.bf16.gmra.mrb[4].mxu1 %vm306_vm1, %v681_v30  ;;  %2585 = vmatmul.mubr.msk.bf16.gmra.mrb[8].mxu0 %vm306_vm1, %v1431_v32  ;;  %v1652_v32 = vrot.slane %v1650_v27, 3 }
  0x6b   : > { %2496 = vmatprep.mubr.msk.bf16.mxu1 %vm2878_vm0, %v2877_v1  ;;  %2588 = vmatprep.mubr.msk.bf16.mxu0 %vm2878_vm0, %v2877_v1 }
  0x6c   : > { %v1653_v34 = vor.u32 %v1652_v32, %v1649_v31 }
  0x72   : > { %2497 = vmatmul.mubr.msk.bf16.gmra.mrb[8].mxu1 %vm306_vm1, %v683_v35  ;;  %2589 = vmatmul.mubr.msk.bf16.gmra.mrb[12].mxu0 %vm306_vm1, %v3013_v59  ;;  %v1616_v59 = vrot.slane %v1614_v42, 3  ;;  %v2860_v35 = vld [vmem:[%s2941_s27 + $0x8] sm:$0xf8]  }
  0x73   : > { %2500 = vmatprep.mubr.msk.bf16.mxu1 %vm2878_vm0, %v2877_v1  ;;  %2592 = vmatprep.mubr.msk.bf16.mxu0 %vm2878_vm0, %v2877_v1  ;;  %v1821_v36 = vrot.slane %v2860_v35, 3  ;;  %v2867_v42 = vld [vmem:[%s2941_s27 + $0x28] sm:$0xff]   ;;  %s2793_s27 = smul.u32 40, %s3290_s19 }
  0x74   : > { %v1617_v52 = vor.u32 %v1616_v59, %v1613_v47 }
  0x75   : > { %v1823_v38 = vsel %vm1820_vm7, %v1821_v36, %v1822_v37  ;;  %s3265_s17 = scalar_lea.vmem %s3286_s3, %s2793_s27 }
  0x76   : > { %v1618_v61 = vsel %vm1601_vm6, %v1609_v51, %v1617_v52  ;;  %v1627_v11 = vsel %vm1601_vm6, %v1617_v52, %v1626_v4 }
  0x7a   : > { %2501 = vmatmul.mubr.msk.bf16.gmra.mrb[12].mxu1 %vm306_vm1, %v685_v43  ;;  %2593 = vmatmul.mubr.msk.bf16.gmra.mrb[16].mxu0 %vm306_vm1, %v3022_v5  ;;  %v2849_v5 = vld [vmem:[%s3284_s1 + $0x40] sm:$0xff]  }
  0x7b   : > { %2504 = vmatprep.mubr.msk.bf16.mxu1 %vm2878_vm0, %v2877_v1  ;;  %2598 = vmatprep.mubr.msk.bf16.mxu0 %vm2878_vm0, %v2877_v1 }
  0x82   : > { %2505 = vmatmul.mubr.msk.bf16.gmra.mrb[16].mxu1 %vm306_vm1, %v687_v55  ;;  %2599 = vmatmul.mubr.msk.bf16.vlgmr.msra.gmra.mrb[0].mxu0 %vm306_vm1, %v1618_v61 }
  0x83   : > { %2510 = vmatprep.mubr.msk.bf16.mxu1 %vm2878_vm0, %v2877_v1  ;;  %2619 = vmatpush3.bf16.msra.mxu0 %v2849_v5 }
  0x84   : > { %2602 = vmatprep.mubr.msk.bf16.mxu0 %vm2878_vm0, %v2877_v1 }
  0x8a   : > { %2511 = vmatmul.mubr.msk.bf16.vlgmr.msra.gmra.mrb[0].mxu1 %vm306_vm1, %v855_v9  ;;  %2603 = vmatmul.mubr.msk.bf16.gmra.mrb[4].mxu0 %vm306_vm1, %v1627_v11 }
  0x8b   : > { %2514 = vmatprep.mubr.msk.bf16.mxu1 %vm2878_vm0, %v2877_v1  ;;  %2606 = vmatprep.mubr.msk.bf16.mxu0 %vm2878_vm0, %v2877_v1 }
  0x8c   : > { %2641 = vmatpush3.bf16.msra.mxu1 %v2926_v2  ;;  %v1644_v2 = vor.u32 %v1643_v23, %v1640_v22 }
  0x8e   : > { %v1645_v30 = vsel %vm1601_vm6, %v1635_v16, %v1644_v2  ;;  %v1654_v18 = vsel %vm1601_vm6, %v1644_v2, %v1653_v34 }
  0x92   : > { %2515 = vmatmul.mubr.msk.bf16.gmra.mrb[4].mxu1 %vm306_vm1, %v857_v20  ;;  %2607 = vmatmul.mubr.msk.bf16.gmra.mrb[8].mxu0 %vm306_vm1, %v1636_v21 }
  0x93   : > { %2518 = vmatprep.mubr.msk.bf16.mxu1 %vm2878_vm0, %v2877_v1  ;;  %2610 = vmatprep.mubr.msk.bf16.mxu0 %vm2878_vm0, %v2877_v1 }
  0x9a   : > { %2519 = vmatmul.mubr.msk.bf16.gmra.mrb[8].mxu1 %vm306_vm1, %v859_v28  ;;  %2611 = vmatmul.mubr.msk.bf16.gmra.mrb[12].mxu0 %vm306_vm1, %v1645_v30 }
  0x9b   : > { %2522 = vmatprep.mubr.msk.bf16.mxu1 %vm2878_vm0, %v2877_v1  ;;  %2614 = vmatprep.mubr.msk.bf16.mxu0 %vm2878_vm0, %v2877_v1 }
  0xa2   : > { %2523 = vmatmul.mubr.msk.bf16.gmra.mrb[12].mxu1 %vm306_vm1, %v3054_v29  ;;  %2615 = vmatmul.mubr.msk.bf16.gmra.mrb[16].mxu0 %vm306_vm1, %v1654_v18  ;;  %v1824_v29 = vrot.slane %v2863_v49, 3 }
  0xa3   : > { %2526 = vmatprep.mubr.msk.bf16.mxu1 %vm2878_vm0, %v2877_v1  ;;  %2620 = vmatprep.mubr.msk.bf16.mxu0 %vm2878_vm0, %v2877_v1 }
  0xa4   : > { %v1825_v56 = vsel %vm1820_vm7, %v1822_v37, %v1824_v29  ;;  %v1979_v8 = vpop.permute.xlu1 %1978 }
  0xa8   : > { %v1984_v26 = vpop.permute.xlu1 %1983 }
  0xaa   : > { %2527 = vmatmul.mubr.msk.bf16.gmra.mrb[16].mxu1 %vm306_vm1, %v3065_v40  ;;  %2621 = vmatmul.mubr.msk.bf16.vlgmr.msra.gmra.mrb[0].mxu0 %vm306_vm1, %v1823_v38  ;;  %v1826_v40 = vrot.slane %v2865_v39, 3 }
  0xab   : > { %2544 = vmatprep.mubr.msk.bf16.mxu1 %vm2878_vm0, %v2877_v1  ;;  %2624 = vmatprep.mubr.msk.bf16.mxu0 %vm2878_vm0, %v2877_v1 }
  0xac   : > { %v1827_v41 = vsel %vm1820_vm7, %v1824_v29, %v1826_v40 }
  0xb2   : > { %2545 = vmatmul.mubr.msk.bf16.vlgmr.msra.gmra.mrb[12].mxu1 %vm306_vm1, %v3080_v57  ;;  %2625 = vmatmul.mubr.msk.bf16.gmra.mrb[4].mxu0 %vm306_vm1, %v1825_v56  ;;  %v1828_v57 = vrot.slane %v2867_v42, 3 }
  0xb3   : > { %2548 = vmatprep.mubr.msk.bf16.mxu1 %vm2878_vm0, %v2877_v1  ;;  %2628 = vmatprep.mubr.msk.bf16.mxu0 %vm2878_vm0, %v2877_v1 }
  0xb4   : > { %v1829_v43 = vsel %vm1820_vm7, %v1826_v40, %v1828_v57  ;;  %v1831_v46 = vsel %vm1820_vm7, %v1828_v57, %v1830_v45  ;;  %v1969_v61 = vpop.permute.xlu0 %1968 }
  0xba   : > { %2549 = vmatmul.mubr.msk.bf16.gmra.mrb[16].mxu1 %vm306_vm1, %v3095_v6  ;;  %2629 = vmatmul.mubr.msk.bf16.gmra.mrb[8].mxu0 %vm306_vm1, %v1827_v41 }
  0xbb   : > { %2632 = vmatprep.mubr.msk.bf16.mxu0 %vm2878_vm0, %v2877_v1  ;;  %v1974_v63 = vpop.permute.xlu0 %1973 }
  0xbf   : > { %v1989_v31 = vpop.permute.xlu0 %1988 }
  0xc2   : > { %2633 = vmatmul.mubr.msk.bf16.gmra.mrb[12].mxu0 %vm306_vm1, %v1829_v43  ;;  %v1994_v43 = vpop.permute.xlu1 %1993 }
  0xc3   : > { %2636 = vmatprep.mubr.msk.bf16.mxu0 %vm2878_vm0, %v2877_v1 }
  0xca   : > { %2637 = vmatmul.mubr.msk.bf16.gmra.mrb[16].mxu0 %vm306_vm1, %v1831_v46 }
 0x15d   : > { %v919_v6 = vpop.f32.mrb[0].mxu1 }
 0x15e   : > { %v2512_v47 = vpop.f32.mrb[1].mxu1 }
 0x15f   : > { %v922_v59 = vpop.f32.mrb[2].mxu1 }
 0x160   : > { %v2513_v48 = vpop.f32.mrb[3].mxu1 }
 0x165   : > { %v927_v50 = vpop.f32.mrb[4].mxu1 }
 0x166   : > { %v2516_v51 = vpop.f32.mrb[5].mxu1 }
 0x167   : > { %v930_v52 = vpop.f32.mrb[6].mxu1 }
 0x168   : > { %v2517_v53 = vpop.f32.mrb[7].mxu1 }
 0x16d   : > { %v935_v54 = vpop.f32.mrb[8].mxu1 }
 0x16e   : > { %v2520_v55 = vpop.f32.mrb[9].mxu1 }
 0x16f   : > { %v938_v58 = vpop.f32.mrb[10].mxu1 }
 0x170   : > { %v2521_v60 = vpop.f32.mrb[11].mxu1 }
 0x17d   : > { %v1887_v1 = vpop.f32.mrb[0].mxu0 }
 0x17e   : > { %v2642_v5 = vadd.f32 %v1887_v1, %v919_v6  ;;  %v2622_v62 = vpop.f32.mrb[1].mxu0  ;;  %v2004_v1 = vpop.permute.xlu1 %2003 }
 0x17f   : > { %v1890_v33 = vpop.f32.mrb[2].mxu0 }
 0x180   : > { %v2016_v0 = vmul.f32 %v2642_v5, %v1969_v61  ;;  %v2643_v3 = vadd.f32 %v1890_v33, %v922_v59  ;;  %v2623_v4 = vpop.f32.mrb[3].mxu0 }
 0x182   : > { %v2017_v7 = vmul.f32 %v2643_v3, %v1974_v63  ;;  %v2092_v9 = vmul.f32 %v2016_v0, %v2016_v0 }
 0x184   : > { %v2362_v10 = vpack.c.bf16 %v2017_v7, %v2016_v0  ;;  %v2076_v11 = vadd.f32 %v2017_v7, %v2016_v0  ;;  %v2093_v12 = vmul.f32 %v2017_v7, %v2017_v7 }
 0x185   : > { %v1162_v13 = vpop.f32.mrb[12].mxu1  ;;  %v1895_v14 = vpop.f32.mrb[4].mxu0 }
 0x186   : > { %v2546_v15 = vpop.f32.mrb[13].mxu1  ;;  %2363 = vst [vmem:[%s3265_s17] sm:$0xff] %v2362_v10   ;;  %v2102_v16 = vadd.f32 %v2093_v12, %v2092_v9  ;;  %v2644_v17 = vadd.f32 %v1895_v14, %v927_v50  ;;  %v2626_v19 = vpop.f32.mrb[5].mxu0 }
 0x187   : > { %v1165_v20 = vpop.f32.mrb[14].mxu1  ;;  %v1898_v21 = vpop.f32.mrb[6].mxu0 }
 0x188   : > { %v2547_v22 = vpop.f32.mrb[15].mxu1  ;;  %v2018_v23 = vmul.f32 %v2644_v17, %v1979_v8  ;;  %v2645_v25 = vadd.f32 %v1898_v21, %v930_v52  ;;  %v2627_v2 = vpop.f32.mrb[7].mxu0 }
 0x18a   : > { %v2077_v27 = vadd.f32 %v2076_v11, %v2018_v23  ;;  %v2094_v28 = vmul.f32 %v2018_v23, %v2018_v23  ;;  %v2019_v30 = vmul.f32 %v2645_v25, %v1984_v26 }
 0x18c   : > { %v2103_v32 = vadd.f32 %v2102_v16, %v2094_v28  ;;  %v2367_v34 = vpack.c.bf16 %v2019_v30, %v2018_v23  ;;  %v2078_v18 = vadd.f32 %v2077_v27, %v2019_v30  ;;  %v2095_v35 = vmul.f32 %v2019_v30, %v2019_v30  ;;  %v2014_v16 = vpop.permute.xlu1 %2013 }
 0x18d   : > { %v1170_v24 = vpop.f32.mrb[16].mxu1  ;;  %v1903_v36 = vpop.f32.mrb[8].mxu0 }
 0x18e   : > { %v2550_v37 = vpop.f32.mrb[17].mxu1  ;;  %2384 = vst [vmem:[%s3265_s17 + $0x8] sm:$0xff] %v2367_v34   ;;  %v2104_v38 = vadd.f32 %v2103_v32, %v2095_v35  ;;  %v2646_v49 = vadd.f32 %v1903_v36, %v935_v54  ;;  %v2630_v29 = vpop.f32.mrb[9].mxu0 }
 0x18f   : > { %v1173_v56 = vpop.f32.mrb[18].mxu1  ;;  %v1906_v39 = vpop.f32.mrb[10].mxu0 }
 0x190   : > { %v2551_v40 = vpop.f32.mrb[19].mxu1  ;;  %v2020_v41 = vmul.f32 %v2646_v49, %v1989_v31  ;;  %v2647_v42 = vadd.f32 %v1906_v39, %v938_v58  ;;  %v2631_v57 = vpop.f32.mrb[11].mxu0 }
 0x191   : > { %v1999_v54 = vpop.permute.xlu0 %1998 }
 0x192   : > { %v2079_v44 = vadd.f32 %v2078_v18, %v2020_v41  ;;  %v2096_v45 = vmul.f32 %v2020_v41, %v2020_v41  ;;  %v2021_v46 = vmul.f32 %v2647_v42, %v1994_v43 }
 0x194   : > { %v2105_v6 = vadd.f32 %v2104_v38, %v2096_v45  ;;  %v2372_v47 = vpack.c.bf16 %v2021_v46, %v2020_v41  ;;  %v2080_v59 = vadd.f32 %v2079_v44, %v2021_v46  ;;  %v2097_v48 = vmul.f32 %v2021_v46, %v2021_v46 }
 0x195   : > { %v1911_v50 = vpop.f32.mrb[12].mxu0  ;;  %v2009_v11 = vpop.permute.xlu0 %2008 }
 0x196   : > { %2385 = vst [vmem:[%s3265_s17 + $0x10] sm:$0xff] %v2372_v47   ;;  %v2106_v51 = vadd.f32 %v2105_v6, %v2097_v48  ;;  %v2648_v52 = vadd.f32 %v1911_v50, %v1162_v13  ;;  %v2634_v53 = vpop.f32.mrb[13].mxu0 }
 0x197   : > { %v1914_v55 = vpop.f32.mrb[14].mxu0 }
 0x198   : > { %v2022_v60 = vmul.f32 %v2648_v52, %v1999_v54  ;;  %v2649_v61 = vadd.f32 %v1914_v55, %v1165_v20  ;;  %v2635_v58 = vpop.f32.mrb[15].mxu0 }
 0x19a   : > { %v2081_v5 = vadd.f32 %v2080_v59, %v2022_v60  ;;  %v2098_v62 = vmul.f32 %v2022_v60, %v2022_v60  ;;  %v2023_v33 = vmul.f32 %v2649_v61, %v2004_v1 }
 0x19c   : > { %v2107_v63 = vadd.f32 %v2106_v51, %v2098_v62  ;;  %v2377_v0 = vpack.c.bf16 %v2023_v33, %v2022_v60  ;;  %v2082_v3 = vadd.f32 %v2081_v5, %v2023_v33  ;;  %v2099_v4 = vmul.f32 %v2023_v33, %v2023_v33 }
 0x19d   : > { %v1919_v7 = vpop.f32.mrb[16].mxu0 }
 0x19e   : > { %2386 = vst [vmem:[%s3265_s17 + $0x18] sm:$0xff] %v2377_v0   ;;  %v2108_v8 = vadd.f32 %v2107_v63, %v2099_v4  ;;  %v2650_v9 = vadd.f32 %v1919_v7, %v1170_v24  ;;  %v2638_v10 = vpop.f32.mrb[17].mxu0 }
 0x19f   : > { %v1922_v12 = vpop.f32.mrb[18].mxu0 }
 0x1a0   : > { %v2024_v13 = vmul.f32 %v2650_v9, %v2009_v11  ;;  %v2651_v14 = vadd.f32 %v1922_v12, %v1173_v56  ;;  %v2639_v15 = vpop.f32.mrb[19].mxu0 }
 0x1a2   : > { %v2083_v17 = vadd.f32 %v2082_v3, %v2024_v13  ;;  %v2100_v19 = vmul.f32 %v2024_v13, %v2024_v13  ;;  %v2025_v20 = vmul.f32 %v2651_v14, %v2014_v16 }
 0x1a4   : > { %v2109_v21 = vadd.f32 %v2108_v8, %v2100_v19  ;;  %v2382_v22 = vpack.c.bf16 %v2025_v20, %v2024_v13  ;;  %v2084_v23 = vadd.f32 %v2083_v17, %v2025_v20  ;;  %v2101_v25 = vmul.f32 %v2025_v20, %v2025_v20 }
 0x1a6   : > { %2387 = vst [vmem:[%s3265_s17 + $0x20] sm:$0xff] %v2382_v22   ;;  %v2085_v2 = vrot.slane %v2084_v23, 4  ;;  %v2110_v26 = vadd.f32 %v2109_v21, %v2101_v25 }
 0x1a8   : > { %v2086_v27 = vadd.f32 %v2085_v2, %v2084_v23  ;;  %v2111_v28 = vrot.slane %v2110_v26, 4 }
 0x1aa   : > { %v2087_v30 = vrot.slane %v2086_v27, 2  ;;  %v2112_v31 = vadd.f32 %v2111_v28, %v2110_v26 }
 0x1ac   : > { %v2088_v32 = vadd.f32 %v2087_v30, %v2086_v27  ;;  %v2113_v34 = vrot.slane %v2112_v31, 2 }
 0x1ae   : > { %v2089_v18 = vrot.slane %v2088_v32, 1  ;;  %v2114_v35 = vadd.f32 %v2113_v34, %v2112_v31 }
 0x1b0   : > { %v2090_v24 = vadd.f32 %v2089_v18, %v2088_v32  ;;  %v2115_v36 = vrot.slane %v2114_v35, 1 }
 0x1b2   : > { %2091 = vst [vmem:[%s238_s22] sm:$0x1] %v2090_v24  ;;  %v2116_v37 = vadd.f32 %v2115_v36, %v2114_v35 }
 0x1b4   : > { %2117 = vst [vmem:[%s241_s25] sm:$0x1] %v2116_v37 }
 0x1b5 PF: > { %s16_s18 = sadd.s32 1, %s2875_s18  }
 0x1b6   : > { %p13_p4 = scmp.ge.s32.totalorder %s16_s18, 4  }
 0x1b8   :  { %15 = sbr.rel (!%p13_p4) target bundleno = 1 (0x1), region = 86 }

</bundles_post_ra>
